<compile_context>
chip_gen: v6e
topology: v6e:2x2x1
jax: 0.10.0
libtpu: 0.0.40
codegen_flags: <defaults>
</compile_context>

<pallas_src>
import functools

import numpy as np
import jax
import jax.numpy as jnp
from jax import lax
from jax.experimental import pallas as pl
from jax.experimental.pallas import tpu as pltpu


# ----------------------------------------------------------------------------
# Shared math helpers (used inside kernels and in the pure-JAX reference)
# ----------------------------------------------------------------------------
def _layernorm(x, gamma, beta, eps):
    x = x.astype(jnp.float32)                       # fp32 statistics
    mu = jnp.mean(x, axis=-1, keepdims=True)
    xc = x - mu
    var = jnp.mean(xc * xc, axis=-1, keepdims=True)
    return xc * jax.lax.rsqrt(var + eps) * gamma + beta


def _gelu_tanh(x):
    # matches torch.nn.functional.gelu(x, approximate='tanh'), fp32 math
    c = 0.7978845608028654  # sqrt(2/pi)
    return 0.5 * x * (1.0 + jnp.tanh(c * (x + 0.044715 * x * x * x)))


# ----------------------------------------------------------------------------
# Small utilities
# ----------------------------------------------------------------------------
def _pick_tile(n, cap, mult):
    """Largest divisor of n that is <= cap and a multiple of `mult`, else n."""
    if n <= cap:
        return n
    for t in range(cap, mult - 1, -1):
        if n % t == 0 and t % mult == 0:
            return t
    return n


def _cparams(semantics, blocks):
    """CompilerParams with vmem_limit_bytes sized from the live block set."""
    vmem = 0
    for shape, dtype in blocks:
        vmem += 2 * int(np.prod(shape)) * np.dtype(dtype).itemsize  # dbl buffer
    vmem = int(min(max(2 * vmem, 16 * 2**20), 64 * 2**20))          # margin+clamp
    return pltpu.CompilerParams(dimension_semantics=semantics,
                                vmem_limit_bytes=vmem)


# ----------------------------------------------------------------------------
# Pallas kernels
# ----------------------------------------------------------------------------
def embed_kernel(p_ref, w_ref, b_ref, pos_ref, o_ref, *, compute_dtype):
    # p_ref: (1, TS, C*P*P)  w_ref: (C*P*P, E)  b_ref: (1, E)  pos_ref: (TS, E)
    patches = p_ref[0].astype(compute_dtype)
    emb = jnp.dot(patches, w_ref[...], preferred_element_type=jnp.float32)
    o_ref[0] = (emb + b_ref[...] + pos_ref[...]).astype(o_ref.dtype)


def ln_qkv_kernel(x_ref, wqkv_ref, bqkv_ref, g1_ref, b1_ref, o_ref,
                  *, eps, compute_dtype):
    # LN1 (fp32 stats) + fused QKV projection (one (TS,E)x(E,3E) MXU matmul).
    x = x_ref[0]                                            # (TS, E) fp32
    h = _layernorm(x, g1_ref[...], b1_ref[...], eps).astype(compute_dtype)
    qkv = jnp.dot(h, wqkv_ref[...],
                  preferred_element_type=jnp.float32) + bqkv_ref[...]
    o_ref[0] = qkv.astype(o_ref.dtype)


def attn_core_kernel(q_ref, k_ref, v_ref, o_ref, *, scale, compute_dtype):
    # One (batch, head) grid point.  2-D dot_general with contraction on the
    # last dims avoids materializing k.T; softmax stats in fp32; divide via
    # the EUP approximate reciprocal.
    q = q_ref[0, 0]                                         # (S, D)
    k = k_ref[0, 0]
    v = v_ref[0, 0]
    s = lax.dot_general(q, k, (((1,), (1,)), ((), ())),
                        preferred_element_type=jnp.float32) * scale
    m = jnp.max(s, axis=-1, keepdims=True)
    p = jnp.exp(s - m)
    l = jnp.sum(p, axis=-1, keepdims=True)
    p = p * pl.reciprocal(l, approx=True)
    ctx = jnp.dot(p.astype(compute_dtype), v,
                  preferred_element_type=jnp.float32)
    o_ref[0, 0] = ctx.astype(o_ref.dtype)


def out_proj_kernel(ctx_ref, res_ref, wo_ref, bo_ref, o_ref):
    ctx = ctx_ref[0]                                        # (TS, E) compute dtype
    attn = jnp.dot(ctx, wo_ref[...],
                   preferred_element_type=jnp.float32) + bo_ref[...]
    o_ref[0] = (res_ref[0] + attn).astype(o_ref.dtype)      # residual add (fp32)


def mlp_ln_kernel(h_ref, w1_ref, b1_ref, w2_ref, b2_ref, g_ref, bt_ref,
                  o_ref, acc_ref, *, eps, compute_dtype):
    # First MLP of the layer, tiled over the intermediate dim (grid axis 2)
    # with a fp32 VMEM accumulator; LN2 fused into the epilogue.
    i = pl.program_id(2)

    @pl.when(i == 0)
    def _():
        acc_ref[...] = jnp.zeros_like(acc_ref)

    h = h_ref[0].astype(compute_dtype)                      # (TS, E)
    u = jnp.dot(h, w1_ref[...],
                preferred_element_type=jnp.float32) + b1_ref[...]
    u = _gelu_tanh(u).astype(compute_dtype)                 # (TS, TI)
    acc_ref[...] += jnp.dot(u, w2_ref[...],
                            preferred_element_type=jnp.float32)

    @pl.when(i == pl.num_programs(2) - 1)
    def _():
        t = acc_ref[...] + b2_ref[...]
        o_ref[0] = _layernorm(t, g_ref[...], bt_ref[...], eps).astype(o_ref.dtype)


def mlp_res_kernel(t_ref, res_ref, w1_ref, b1_ref, w2_ref, b2_ref,
                   pg_ref, pb_ref, o_ref, acc_ref,
                   *, eps, compute_dtype, apply_post_ln):
    # Second MLP of the layer (same intermediate tiling); epilogue adds the
    # residual and, for the final layer, the fused post_layernorm.
    i = pl.program_id(2)

    @pl.when(i == 0)
    def _():
        acc_ref[...] = jnp.zeros_like(acc_ref)

    t = t_ref[0]                                            # (TS, E) compute dtype
    u = jnp.dot(t, w1_ref[...],
                preferred_element_type=jnp.float32) + b1_ref[...]
    u = _gelu_tanh(u).astype(compute_dtype)
    acc_ref[...] += jnp.dot(u, w2_ref[...],
                            preferred_element_type=jnp.float32)

    @pl.when(i == pl.num_programs(2) - 1)
    def _():
        y = res_ref[0] + acc_ref[...] + b2_ref[...]
        if apply_post_ln:                                   # static python flag
            y = _layernorm(y, pg_ref[...], pb_ref[...], eps)
        o_ref[0] = y.astype(o_ref.dtype)


# ----------------------------------------------------------------------------
# pallas_call wrappers
# ----------------------------------------------------------------------------
def patch_embed(patches, w, b, pos, compute_dtype, seq_cap=256):
    B, N, CPP = patches.shape
    E = w.shape[1]
    TS = _pick_tile(N, seq_cap, 8)
    blocks = [((1, TS, CPP), patches.dtype), (w.shape, w.dtype),
              (b.shape, b.dtype), ((TS, E), pos.dtype),
              ((1, TS, E), jnp.float32)]
    return pl.pallas_call(
        functools.partial(embed_kernel, compute_dtype=compute_dtype),
        out_shape=jax.ShapeDtypeStruct((B, N, E), jnp.float32),
        grid=(B, N // TS),
        in_specs=[pl.BlockSpec((1, TS, CPP), lambda bb, ss: (bb, ss, 0)),
                  pl.BlockSpec(w.shape, lambda bb, ss: (0, 0)),
                  pl.BlockSpec(b.shape, lambda bb, ss: (0, 0)),
                  pl.BlockSpec((TS, E), lambda bb, ss: (ss, 0))],
        out_specs=pl.BlockSpec((1, TS, E), lambda bb, ss: (bb, ss, 0)),
        compiler_params=_cparams(("parallel", "parallel"), blocks),
    )(patches, w, b, pos)


def ln_qkv(x, wqkv, bqkv, g1, b1, eps, compute_dtype, seq_cap=256):
    B, S, E = x.shape
    E3 = wqkv.shape[1]
    TS = _pick_tile(S, seq_cap, 8)
    blocks = [((1, TS, E), x.dtype), (wqkv.shape, wqkv.dtype),
              (bqkv.shape, bqkv.dtype), (g1.shape, g1.dtype),
              (b1.shape, b1.dtype), ((1, TS, E3), compute_dtype)]
    return pl.pallas_call(
        functools.partial(ln_qkv_kernel, eps=eps, compute_dtype=compute_dtype),
        out_shape=jax.ShapeDtypeStruct((B, S, E3), compute_dtype),
        grid=(B, S // TS),
        in_specs=[pl.BlockSpec((1, TS, E), lambda bb, ss: (bb, ss, 0)),
                  pl.BlockSpec(wqkv.shape, lambda bb, ss: (0, 0)),
                  pl.BlockSpec(bqkv.shape, lambda bb, ss: (0, 0)),
                  pl.BlockSpec(g1.shape, lambda bb, ss: (0, 0)),
                  pl.BlockSpec(b1.shape, lambda bb, ss: (0, 0))],
        out_specs=pl.BlockSpec((1, TS, E3), lambda bb, ss: (bb, ss, 0)),
        compiler_params=_cparams(("parallel", "parallel"), blocks),
    )(x, wqkv, bqkv, g1, b1)


def attn_core(q, k, v, scale, compute_dtype):
    # TODO(synk): for very long sequences, grid the Q dim flash-style and tile
    # K/V instead of holding the full (S, S) score tile per head.
    B, H, S, D = q.shape
    blk = (1, 1, S, D)
    spec = pl.BlockSpec(blk, lambda bb, hh: (bb, hh, 0, 0))
    blocks = [(blk, q.dtype)] * 3 + [(blk, compute_dtype), ((S, S), jnp.float32)]
    return pl.pallas_call(
        functools.partial(attn_core_kernel, scale=scale,
                          compute_dtype=compute_dtype),
        out_shape=jax.ShapeDtypeStruct((B, H, S, D), compute_dtype),
        grid=(B, H),
        in_specs=[spec, spec, spec],
        out_specs=spec,
        compiler_params=_cparams(("parallel", "parallel"), blocks),
    )(q, k, v)


def attn_out_proj(ctx, resid, wo, bo, seq_cap=256):
    B, S, E = resid.shape
    TS = _pick_tile(S, seq_cap, 8)
    blocks = [((1, TS, E), ctx.dtype), ((1, TS, E), resid.dtype),
              (wo.shape, wo.dtype), (bo.shape, bo.dtype),
              ((1, TS, E), jnp.float32)]
    return pl.pallas_call(
        out_proj_kernel,
        out_shape=jax.ShapeDtypeStruct((B, S, E), jnp.float32),
        grid=(B, S // TS),
        in_specs=[pl.BlockSpec((1, TS, E), lambda bb, ss: (bb, ss, 0)),
                  pl.BlockSpec((1, TS, E), lambda bb, ss: (bb, ss, 0)),
                  pl.BlockSpec(wo.shape, lambda bb, ss: (0, 0)),
                  pl.BlockSpec(bo.shape, lambda bb, ss: (0, 0))],
        out_specs=pl.BlockSpec((1, TS, E), lambda bb, ss: (bb, ss, 0)),
        compiler_params=_cparams(("parallel", "parallel"), blocks),
    )(ctx, resid, wo, bo)


def _mlp_specs(TS, TI, E):
    return [pl.BlockSpec((E, TI), lambda bb, ss, ii: (0, ii)),   # w_fc1 tile
            pl.BlockSpec((1, TI), lambda bb, ss, ii: (0, ii)),   # b_fc1 tile
            pl.BlockSpec((TI, E), lambda bb, ss, ii: (ii, 0)),   # w_fc2 tile
            pl.BlockSpec((1, E), lambda bb, ss, ii: (0, 0))]     # b_fc2


def mlp_then_ln(h, w1, b1, w2, b2, g2, bt2, eps, compute_dtype,
                seq_cap=256, inter_cap=512):
    B, S, E = h.shape
    I = w1.shape[1]
    TS = _pick_tile(S, seq_cap, 8)
    TI = _pick_tile(I, inter_cap, 128)
    blocks = [((1, TS, E), h.dtype), ((E, TI), w1.dtype), ((1, TI), b1.dtype),
              ((TI, E), w2.dtype), ((1, E), b2.dtype), ((1, E), g2.dtype),
              ((1, E), bt2.dtype), ((1, TS, E), compute_dtype),
              ((TS, E), jnp.float32)]
    return pl.pallas_call(
        functools.partial(mlp_ln_kernel, eps=eps, compute_dtype=compute_dtype),
        out_shape=jax.ShapeDtypeStruct((B, S, E), compute_dtype),
        grid=(B, S // TS, I // TI),
        in_specs=[pl.BlockSpec((1, TS, E), lambda bb, ss, ii: (bb, ss, 0))]
                 + _mlp_specs(TS, TI, E)
                 + [pl.BlockSpec((1, E), lambda bb, ss, ii: (0, 0)),
                    pl.BlockSpec((1, E), lambda bb, ss, ii: (0, 0))],
        out_specs=pl.BlockSpec((1, TS, E), lambda bb, ss, ii: (bb, ss, 0)),
        scratch_shapes=[pltpu.VMEM((TS, E), jnp.float32)],
        compiler_params=_cparams(("parallel", "parallel", "arbitrary"), blocks),
    )(h, w1, b1, w2, b2, g2, bt2)


def mlp_add_residual(t, resid, w1, b1, w2, b2, post_g, post_b, eps,
                     compute_dtype, apply_post_ln, seq_cap=256, inter_cap=512):
    B, S, E = resid.shape
    I = w1.shape[1]
    TS = _pick_tile(S, seq_cap, 8)
    TI = _pick_tile(I, inter_cap, 128)
    blocks = [((1, TS, E), t.dtype), ((1, TS, E), resid.dtype),
              ((E, TI), w1.dtype), ((1, TI), b1.dtype), ((TI, E), w2.dtype),
              ((1, E), b2.dtype), ((1, E), post_g.dtype), ((1, E), post_b.dtype),
              ((1, TS, E), jnp.float32), ((TS, E), jnp.float32)]
    return pl.pallas_call(
        functools.partial(mlp_res_kernel, eps=eps, compute_dtype=compute_dtype,
                          apply_post_ln=apply_post_ln),
        out_shape=jax.ShapeDtypeStruct((B, S, E), jnp.float32),
        grid=(B, S // TS, I // TI),
        in_specs=[pl.BlockSpec((1, TS, E), lambda bb, ss, ii: (bb, ss, 0)),
                  pl.BlockSpec((1, TS, E), lambda bb, ss, ii: (bb, ss, 0))]
                 + _mlp_specs(TS, TI, E)
                 + [pl.BlockSpec((1, E), lambda bb, ss, ii: (0, 0)),
                    pl.BlockSpec((1, E), lambda bb, ss, ii: (0, 0))],
        out_specs=pl.BlockSpec((1, TS, E), lambda bb, ss, ii: (bb, ss, 0)),
        scratch_shapes=[pltpu.VMEM((TS, E), jnp.float32)],
        compiler_params=_cparams(("parallel", "parallel", "arbitrary"), blocks),
    )(t, resid, w1, b1, w2, b2, post_g, post_b)


# ----------------------------------------------------------------------------
# Full model forward (Pallas)
# ----------------------------------------------------------------------------
def extract_patches(pixel_values, patch_size):
    # Conv2d(kernel=stride=P, padding='valid') == patch-wise matmul (XLA glue).
    B, C, H, W = pixel_values.shape
    P = patch_size
    Hp, Wp = H // P, W // P
    x = pixel_values.reshape(B, C, Hp, P, Wp, P)
    x = x.transpose(0, 2, 4, 1, 3, 5)                  # (B, Hp, Wp, C, P, P)
    return x.reshape(B, Hp * Wp, C * P * P)            # row-major patch order


def _prepare_params(params, compute_dtype):
    """Cast matmul weights to the compute dtype; keep biases/LN params fp32."""
    def cast_layer(lp):
        out = dict(lp)
        for k in ('wqkv', 'wo', 'w_fc1', 'w_fc2'):
            out[k] = lp[k].astype(compute_dtype)
        return out
    p = dict(params)
    p['patch_w'] = params['patch_w'].astype(compute_dtype)
    p['layers'] = [cast_layer(lp) for lp in params['layers']]
    return p


def encoder_layer(h, lp, cfg, post_g, post_b, is_last):
    B, S, E = h.shape
    H = cfg['heads']
    D = E // H
    cd = cfg['compute_dtype']
    eps = cfg['eps']

    # LN1 + fused QKV projection.
    qkv = ln_qkv(h, lp['wqkv'], lp['bqkv'], lp['g1'], lp['b1'], eps, cd)

    # Head split (layout plumbing in XLA, lane dim stays head_dim).
    qkv = qkv.reshape(B, S, 3, H, D)
    qkv = jnp.transpose(qkv, (2, 0, 3, 1, 4))           # (3, B, H, S, D)
    ctx = attn_core(qkv[0], qkv[1], qkv[2], D ** (-0.5), cd)
    ctx = jnp.transpose(ctx, (0, 2, 1, 3)).reshape(B, S, E)

    # Out-projection + residual (residual is the pre-LN1 hidden state).
    h = attn_out_proj(ctx, h, lp['wo'], lp['bo'])

    # MLP -> LN2 -> MLP -> +residual (verbatim quirk of the reference module);
    # post_layernorm is fused into the last layer's epilogue.
    t = mlp_then_ln(h, lp['w_fc1'], lp['b_fc1'], lp['w_fc2'], lp['b_fc2'],
                    lp['g2'], lp['b2'], eps, cd)
    h = mlp_add_residual(t, h, lp['w_fc1'], lp['b_fc1'], lp['w_fc2'],
                         lp['b_fc2'], post_g, post_b, eps, cd,
                         apply_post_ln=is_last)
    return h


def siglip_forward(pixel_values, params, cfg):
    cd = cfg['compute_dtype']
    p = _prepare_params(params, cd)
    patches = extract_patches(pixel_values, cfg['patch_size'])
    h = patch_embed(patches, p['patch_w'], p['patch_b'], p['pos'], cd)
    n_layers = len(p['layers'])
    for idx, lp in enumerate(p['layers']):
        h = encoder_layer(h, lp, cfg, p['post_g'], p['post_b'],
                          is_last=(idx == n_layers - 1))
    return h


# ----------------------------------------------------------------------------
# Pure-JAX reference with identical cast points (for correctness checking)
# ----------------------------------------------------------------------------
def reference_forward(pixel_values, params, cfg):
    cd = cfg['compute_dtype']
    eps = cfg['eps']
    H = cfg['heads']

    patches = extract_patches(pixel_values, cfg['patch_size'])
    h = (jnp.dot(patches.astype(cd), params['patch_w'].astype(cd),
                 preferred_element_type=jnp.float32)
         + params['patch_b'] + params['pos'])
    B, S, E = h.shape
    D = E // H
    scale = D ** (-0.5)

    for lp in params['layers']:
        res = h
        x = _layernorm(h, lp['g1'], lp['b1'], eps).astype(cd)
        qkv = (jnp.dot(x, lp['wqkv'].astype(cd),
                       preferred_element_type=jnp.float32) + lp['bqkv'])
        qkv = qkv.astype(cd).reshape(B, S, 3, H, D).transpose(2, 0, 3, 1, 4)
        q, k, v = qkv[0], qkv[1], qkv[2]
        s = jnp.einsum('bhqd,bhkd->bhqk', q, k,
                       preferred_element_type=jnp.float32) * scale
        p = jax.nn.softmax(s, axis=-1).astype(cd)
        ctx = jnp.einsum('bhqk,bhkd->bhqd', p, v,
                         preferred_element_type=jnp.float32).astype(cd)
        ctx = ctx.transpose(0, 2, 1, 3).reshape(B, S, E)
        attn = (jnp.dot(ctx, lp['wo'].astype(cd),
                        preferred_element_type=jnp.float32) + lp['bo'])
        h = res + attn

        res = h

        def mlp(t):
            u = (jnp.dot(t.astype(cd), lp['w_fc1'].astype(cd),
                         preferred_element_type=jnp.float32) + lp['b_fc1'])
            u = _gelu_tanh(u).astype(cd)
            return (jnp.dot(u, lp['w_fc2'].astype(cd),
                            preferred_element_type=jnp.float32) + lp['b_fc2'])

        m = mlp(h)
        m = _layernorm(m, lp['g2'], lp['b2'], eps)
        m = mlp(m)
        h = res + m

    return _layernorm(h, params['post_g'], params['post_b'], eps)


# ----------------------------------------------------------------------------
# Deterministic parameter init (weights stored (in, out) so kernels do x @ W)
# ----------------------------------------------------------------------------
def init_params(key, cfg):
    E, I, L = cfg['hidden'], cfg['intermediate'], cfg['layers']
    C, P = cfg['channels'], cfg['patch_size']
    N = (cfg['image_size'] // P) ** 2
    CPP = C * P * P

    keys = iter(jax.random.split(key, 5 + 12 * L))

    def nrm(shape, s=0.02):
        return jax.random.normal(next(keys), shape, jnp.float32) * s

    params = {
        'patch_w': nrm((CPP, E)),
        'patch_b': nrm((1, E)),
        'pos': nrm((N, E)),
        'post_g': 1.0 + nrm((1, E)),
        'post_b': nrm((1, E)),
        'layers': [],
    }
    for _ in range(L):
        params['layers'].append({
            'wqkv': nrm((E, 3 * E)), 'bqkv': nrm((1, 3 * E)),   # fused Q/K/V
            'wo': nrm((E, E)), 'bo': nrm((1, E)),
            'g1': 1.0 + nrm((1, E)), 'b1': nrm((1, E)),
            'w_fc1': nrm((E, I)), 'b_fc1': nrm((1, I)),
            'w_fc2': nrm((I, E)), 'b_fc2': nrm((1, E)),
            'g2': 1.0 + nrm((1, E)), 'b2': nrm((1, E)),
        })
    return params


# ----------------------------------------------------------------------------
if __name__ == "__main__":
    base_cfg = dict(hidden=32, intermediate=64, layers=2, heads=4,
                    channels=3, image_size=32, patch_size=8, eps=1e-6)

    key = jax.random.PRNGKey(0)
    k_x, k_p = jax.random.split(key)
    pixel_values = jax.random.normal(
        k_x, (2, base_cfg['channels'], base_cfg['image_size'],
              base_cfg['image_size']), jnp.float32)
    params = init_params(k_p, base_cfg)
    S = (base_cfg['image_size'] // base_cfg['patch_size']) ** 2

    # fp32 path: tight like-for-like check.  (1e-5 is not attainable because
    # the kernel uses pl.reciprocal(approx=True) and the MXU/XLA default f32
    # matmul precisions differ slightly; 5e-3 is still far tighter than the
    # previous 5e-2.)
    cfg32 = dict(base_cfg, compute_dtype=jnp.float32)
    fwd32 = jax.jit(functools.partial(siglip_forward, cfg=cfg32))
    out32 = jax.block_until_ready(fwd32(pixel_values, params))
    ref32 = jax.block_until_ready(reference_forward(pixel_values, params, cfg32))
    assert out32.shape == (2, S, base_cfg['hidden'])
    d32 = float(jnp.max(jnp.abs(out32 - ref32)))
    assert d32 < 5e-3, f"fp32 mismatch vs reference: {d32}"

    # bf16 path (default perf configuration): reference applies the same bf16
    # casts at the same points, so the comparison stays tight.
    cfg16 = dict(base_cfg, compute_dtype=jnp.bfloat16)
    fwd16 = jax.jit(functools.partial(siglip_forward, cfg=cfg16))
    out16 = jax.block_until_ready(fwd16(pixel_values, params))
    ref16 = jax.block_until_ready(reference_forward(pixel_values, params, cfg16))
    d16 = float(jnp.max(jnp.abs(out16 - ref16)))
    assert d16 < 2e-2, f"bf16 mismatch vs reference: {d16}"

    print("KERNEL_OK")
</pallas_src>

<mosaic_0001>
module attributes {stable_mosaic.version = 11 : i64} {
  func.func @ln_qkv_kernel(%arg0: i32, %arg1: i32, %arg2: memref<1x16x32xf32, #tpu.memory_space<vmem>>, %arg3: memref<32x96xf32, #tpu.memory_space<vmem>>, %arg4: memref<1x96xf32, #tpu.memory_space<vmem>>, %arg5: memref<1x32xf32, #tpu.memory_space<vmem>>, %arg6: memref<1x32xf32, #tpu.memory_space<vmem>>, %arg7: memref<1x16x96xf32, #tpu.memory_space<vmem>>) attributes {dimension_semantics = [#tpu.dimension_semantics<parallel>, #tpu.dimension_semantics<parallel>], iteration_bounds = array<i64: 2, 1>, scalar_prefetch = 0 : i64, scratch_operands = 0 : i64, tpu.core_type = #tpu.core_type<tc>, window_params = [{transform_indices = @transform_0, window_bounds = array<i64: 1, 16, 32>}, {pipeline_mode = #tpu.pipeline_mode<synchronous>, transform_indices = @transform_1, window_bounds = array<i64: 32, 96>}, {pipeline_mode = #tpu.pipeline_mode<synchronous>, transform_indices = @transform_2, window_bounds = array<i64: 1, 96>}, {pipeline_mode = #tpu.pipeline_mode<synchronous>, transform_indices = @transform_3, window_bounds = array<i64: 1, 32>}, {pipeline_mode = #tpu.pipeline_mode<synchronous>, transform_indices = @transform_4, window_bounds = array<i64: 1, 32>}, {transform_indices = @transform_5, window_bounds = array<i64: 1, 16, 96>}]} {
    %c0 = arith.constant 0 : index
    %c0_0 = arith.constant 0 : index
    %c0_1 = arith.constant 0 : index
    %0 = vector.load %arg2[%c0, %c0_0, %c0_1] : memref<1x16x32xf32, #tpu.memory_space<vmem>>, vector<1x16x32xf32>
    %1 = vector.shape_cast %0 : vector<1x16x32xf32> to vector<16x32xf32>
    %c0_2 = arith.constant 0 : index
    %c0_3 = arith.constant 0 : index
    %2 = vector.load %arg5[%c0_2, %c0_3] : memref<1x32xf32, #tpu.memory_space<vmem>>, vector<1x32xf32>
    %c0_4 = arith.constant 0 : index
    %c0_5 = arith.constant 0 : index
    %3 = vector.load %arg6[%c0_4, %c0_5] : memref<1x32xf32, #tpu.memory_space<vmem>>, vector<1x32xf32>
    %cst = arith.constant dense<0.000000e+00> : vector<16xf32>
    %4 = vector.multi_reduction <add>, %1, %cst [1] : vector<16x32xf32> to vector<16xf32>
    %5 = vector.shape_cast %4 : vector<16xf32> to vector<16x1xf32>
    %cst_6 = arith.constant 3.200000e+01 : f32
    %6 = vector.broadcast %cst_6 : f32 to vector<16x1xf32>
    %7 = arith.divf %5, %6 : vector<16x1xf32>
    %8 = vector.broadcast %7 : vector<16x1xf32> to vector<16x32xf32>
    %9 = arith.subf %1, %8 : vector<16x32xf32>
    %10 = arith.mulf %9, %9 : vector<16x32xf32>
    %cst_7 = arith.constant dense<0.000000e+00> : vector<16xf32>
    %11 = vector.multi_reduction <add>, %10, %cst_7 [1] : vector<16x32xf32> to vector<16xf32>
    %12 = vector.shape_cast %11 : vector<16xf32> to vector<16x1xf32>
    %cst_8 = arith.constant 3.200000e+01 : f32
    %13 = vector.broadcast %cst_8 : f32 to vector<16x1xf32>
    %14 = arith.divf %12, %13 : vector<16x1xf32>
    %cst_9 = arith.constant 9.99999997E-7 : f32
    %15 = vector.broadcast %cst_9 : f32 to vector<16x1xf32>
    %16 = arith.addf %14, %15 : vector<16x1xf32>
    %17 = math.rsqrt %16 : vector<16x1xf32>
    %18 = vector.broadcast %17 : vector<16x1xf32> to vector<16x32xf32>
    %19 = arith.mulf %9, %18 : vector<16x32xf32>
    %20 = vector.broadcast %2 : vector<1x32xf32> to vector<16x32xf32>
    %21 = arith.mulf %19, %20 : vector<16x32xf32>
    %22 = vector.broadcast %3 : vector<1x32xf32> to vector<16x32xf32>
    %23 = arith.addf %21, %22 : vector<16x32xf32>
    %c0_10 = arith.constant 0 : index
    %c0_11 = arith.constant 0 : index
    %24 = vector.load %arg3[%c0_10, %c0_11] : memref<32x96xf32, #tpu.memory_space<vmem>>, vector<32x96xf32>
    %cst_12 = arith.constant dense<0.000000e+00> : vector<16x96xf32>
    %25 = tpu.matmul %23, %24, %cst_12 {dimension_numbers = #tpu.dot_dimension_numbers<[1], [0], [0], [1], [0, 0, 1, 1], [], []>} : vector<16x32xf32>, vector<32x96xf32>, vector<16x96xf32> -> vector<16x96xf32>
    %c0_13 = arith.constant 0 : index
    %c0_14 = arith.constant 0 : index
    %26 = vector.load %arg4[%c0_13, %c0_14] : memref<1x96xf32, #tpu.memory_space<vmem>>, vector<1x96xf32>
    %27 = vector.broadcast %26 : vector<1x96xf32> to vector<16x96xf32>
    %28 = arith.addf %25, %27 : vector<16x96xf32>
    %c0_15 = arith.constant 0 : index
    %c0_16 = arith.constant 0 : index
    %c0_17 = arith.constant 0 : index
    %29 = vector.load %arg7[%c0_15, %c0_16, %c0_17] : memref<1x16x96xf32, #tpu.memory_space<vmem>>, vector<1x16x96xf32>
    %30 = vector.shape_cast %29 : vector<1x16x96xf32> to vector<16x96xf32>
    %31 = vector.shape_cast %28 : vector<16x96xf32> to vector<1x16x96xf32>
    tpu.vector_store %arg7[%c0_15, %c0_16, %c0_17], %31 {strides = array<i32>} : memref<1x16x96xf32, #tpu.memory_space<vmem>>, vector<1x16x96xf32>,
    return
  }
  func.func @transform_0(%arg0: i32, %arg1: i32) -> (i32, i32, i32) {
    %c0_i32 = arith.constant 0 : i32
    %c0_i32_0 = arith.constant 0 : i32
    return %arg0, %arg1, %c0_i32 : i32, i32, i32
  }
  func.func @transform_1(%arg0: i32, %arg1: i32) -> (i32, i32) {
    %c0_i32 = arith.constant 0 : i32
    %c0_i32_0 = arith.constant 0 : i32
    %c0_i32_1 = arith.constant 0 : i32
    return %c0_i32, %c0_i32_0 : i32, i32
  }
  func.func @transform_2(%arg0: i32, %arg1: i32) -> (i32, i32) {
    %c0_i32 = arith.constant 0 : i32
    %c0_i32_0 = arith.constant 0 : i32
    %c0_i32_1 = arith.constant 0 : i32
    return %c0_i32, %c0_i32_0 : i32, i32
  }
  func.func @transform_3(%arg0: i32, %arg1: i32) -> (i32, i32) {
    %c0_i32 = arith.constant 0 : i32
    %c0_i32_0 = arith.constant 0 : i32
    %c0_i32_1 = arith.constant 0 : i32
    return %c0_i32, %c0_i32_0 : i32, i32
  }
  func.func @transform_4(%arg0: i32, %arg1: i32) -> (i32, i32) {
    %c0_i32 = arith.constant 0 : i32
    %c0_i32_0 = arith.constant 0 : i32
    %c0_i32_1 = arith.constant 0 : i32
    return %c0_i32, %c0_i32_0 : i32, i32
  }
  func.func @transform_5(%arg0: i32, %arg1: i32) -> (i32, i32, i32) {
    %c0_i32 = arith.constant 0 : i32
    %c0_i32_0 = arith.constant 0 : i32
    return %arg0, %arg1, %c0_i32 : i32, i32, i32
  }
}

module attributes {stable_mosaic.version = 11 : i64} {
  func.func @embed_kernel(%arg0: i32, %arg1: i32, %arg2: memref<1x16x192xf32, #tpu.memory_space<vmem>>, %arg3: memref<192x32xf32, #tpu.memory_space<vmem>>, %arg4: memref<1x32xf32, #tpu.memory_space<vmem>>, %arg5: memref<16x32xf32, #tpu.memory_space<vmem>>, %arg6: memref<1x16x32xf32, #tpu.memory_space<vmem>>) attributes {dimension_semantics = [#tpu.dimension_semantics<parallel>, #tpu.dimension_semantics<parallel>], iteration_bounds = array<i64: 2, 1>, scalar_prefetch = 0 : i64, scratch_operands = 0 : i64, tpu.core_type = #tpu.core_type<tc>, window_params = [{transform_indices = @transform_0, window_bounds = array<i64: 1, 16, 192>}, {pipeline_mode = #tpu.pipeline_mode<synchronous>, transform_indices = @transform_1, window_bounds = array<i64: 192, 32>}, {pipeline_mode = #tpu.pipeline_mode<synchronous>, transform_indices = @transform_2, window_bounds = array<i64: 1, 32>}, {transform_indices = @transform_3, window_bounds = array<i64: 16, 32>}, {transform_indices = @transform_4, window_bounds = array<i64: 1, 16, 32>}]} {
    %c0 = arith.constant 0 : index
    %c0_0 = arith.constant 0 : index
    %c0_1 = arith.constant 0 : index
    %0 = vector.load %arg2[%c0, %c0_0, %c0_1] : memref<1x16x192xf32, #tpu.memory_space<vmem>>, vector<1x16x192xf32>
    %1 = vector.shape_cast %0 : vector<1x16x192xf32> to vector<16x192xf32>
    %c0_2 = arith.constant 0 : index
    %c0_3 = arith.constant 0 : index
    %2 = vector.load %arg3[%c0_2, %c0_3] : memref<192x32xf32, #tpu.memory_space<vmem>>, vector<192x32xf32>
    %cst = arith.constant dense<0.000000e+00> : vector<16x32xf32>
    %3 = tpu.matmul %1, %2, %cst {dimension_numbers = #tpu.dot_dimension_numbers<[1], [0], [0], [1], [0, 0, 1, 1], [], []>} : vector<16x192xf32>, vector<192x32xf32>, vector<16x32xf32> -> vector<16x32xf32>
    %c0_4 = arith.constant 0 : index
    %c0_5 = arith.constant 0 : index
    %4 = vector.load %arg4[%c0_4, %c0_5] : memref<1x32xf32, #tpu.memory_space<vmem>>, vector<1x32xf32>
    %5 = vector.broadcast %4 : vector<1x32xf32> to vector<16x32xf32>
    %6 = arith.addf %3, %5 : vector<16x32xf32>
    %c0_6 = arith.constant 0 : index
    %c0_7 = arith.constant 0 : index
    %7 = vector.load %arg5[%c0_6, %c0_7] : memref<16x32xf32, #tpu.memory_space<vmem>>, vector<16x32xf32>
    %8 = arith.addf %6, %7 : vector<16x32xf32>
    %c0_8 = arith.constant 0 : index
    %c0_9 = arith.constant 0 : index
    %c0_10 = arith.constant 0 : index
    %9 = vector.load %arg6[%c0_8, %c0_9, %c0_10] : memref<1x16x32xf32, #tpu.memory_space<vmem>>, vector<1x16x32xf32>
    %10 = vector.shape_cast %9 : vector<1x16x32xf32> to vector<16x32xf32>
    %11 = vector.shape_cast %8 : vector<16x32xf32> to vector<1x16x32xf32>
    tpu.vector_store %arg6[%c0_8, %c0_9, %c0_10], %11 {strides = array<i32>} : memref<1x16x32xf32, #tpu.memory_space<vmem>>, vector<1x16x32xf32>,
    return
  }
  func.func @transform_0(%arg0: i32, %arg1: i32) -> (i32, i32, i32) {
    %c0_i32 = arith.constant 0 : i32
    %c0_i32_0 = arith.constant 0 : i32
    return %arg0, %arg1, %c0_i32 : i32, i32, i32
  }
  func.func @transform_1(%arg0: i32, %arg1: i32) -> (i32, i32) {
    %c0_i32 = arith.constant 0 : i32
    %c0_i32_0 = arith.constant 0 : i32
    %c0_i32_1 = arith.constant 0 : i32
    return %c0_i32, %c0_i32_0 : i32, i32
  }
  func.func @transform_2(%arg0: i32, %arg1: i32) -> (i32, i32) {
    %c0_i32 = arith.constant 0 : i32
    %c0_i32_0 = arith.constant 0 : i32
    %c0_i32_1 = arith.constant 0 : i32
    return %c0_i32, %c0_i32_0 : i32, i32
  }
  func.func @transform_3(%arg0: i32, %arg1: i32) -> (i32, i32) {
    %c0_i32 = arith.constant 0 : i32
    %c0_i32_0 = arith.constant 0 : i32
    return %arg1, %c0_i32 : i32, i32
  }
  func.func @transform_4(%arg0: i32, %arg1: i32) -> (i32, i32, i32) {
    %c0_i32 = arith.constant 0 : i32
    %c0_i32_0 = arith.constant 0 : i32
    return %arg0, %arg1, %c0_i32 : i32, i32, i32
  }
}

module attributes {stable_mosaic.version = 11 : i64} {
  func.func @attn_core_kernel(%arg0: i32, %arg1: i32, %arg2: memref<1x1x16x8xf32, #tpu.memory_space<vmem>>, %arg3: memref<1x1x16x8xf32, #tpu.memory_space<vmem>>, %arg4: memref<1x1x16x8xf32, #tpu.memory_space<vmem>>, %arg5: memref<1x1x16x8xf32, #tpu.memory_space<vmem>>) attributes {dimension_semantics = [#tpu.dimension_semantics<parallel>, #tpu.dimension_semantics<parallel>], iteration_bounds = array<i64: 2, 4>, scalar_prefetch = 0 : i64, scratch_operands = 0 : i64, tpu.core_type = #tpu.core_type<tc>, window_params = [{transform_indices = @transform_0, window_bounds = array<i64: 1, 1, 16, 8>}, {transform_indices = @transform_1, window_bounds = array<i64: 1, 1, 16, 8>}, {transform_indices = @transform_2, window_bounds = array<i64: 1, 1, 16, 8>}, {transform_indices = @transform_3, window_bounds = array<i64: 1, 1, 16, 8>}]} {
    %c0 = arith.constant 0 : index
    %c0_0 = arith.constant 0 : index
    %c0_1 = arith.constant 0 : index
    %c0_2 = arith.constant 0 : index
    %0 = vector.load %arg2[%c0, %c0_0, %c0_1, %c0_2] : memref<1x1x16x8xf32, #tpu.memory_space<vmem>>, vector<1x1x16x8xf32>
    %1 = vector.shape_cast %0 : vector<1x1x16x8xf32> to vector<16x8xf32>
    %c0_3 = arith.constant 0 : index
    %c0_4 = arith.constant 0 : index
    %c0_5 = arith.constant 0 : index
    %c0_6 = arith.constant 0 : index
    %2 = vector.load %arg3[%c0_3, %c0_4, %c0_5, %c0_6] : memref<1x1x16x8xf32, #tpu.memory_space<vmem>>, vector<1x1x16x8xf32>
    %3 = vector.shape_cast %2 : vector<1x1x16x8xf32> to vector<16x8xf32>
    %c0_7 = arith.constant 0 : index
    %c0_8 = arith.constant 0 : index
    %c0_9 = arith.constant 0 : index
    %c0_10 = arith.constant 0 : index
    %4 = vector.load %arg4[%c0_7, %c0_8, %c0_9, %c0_10] : memref<1x1x16x8xf32, #tpu.memory_space<vmem>>, vector<1x1x16x8xf32>
    %5 = vector.shape_cast %4 : vector<1x1x16x8xf32> to vector<16x8xf32>
    %cst = arith.constant dense<0.000000e+00> : vector<16x16xf32>
    %6 = tpu.matmul %1, %3, %cst {dimension_numbers = #tpu.dot_dimension_numbers<[1], [1], [0], [0], [0, 0, 1, 0], [], []>} : vector<16x8xf32>, vector<16x8xf32>, vector<16x16xf32> -> vector<16x16xf32>
    %cst_11 = arith.constant 0.353553385 : f32
    %7 = vector.broadcast %cst_11 : f32 to vector<16x16xf32>
    %8 = arith.mulf %6, %7 : vector<16x16xf32>
    %cst_12 = arith.constant dense<0xFF800000> : vector<16xf32>
    %9 = vector.multi_reduction <maximumf>, %8, %cst_12 [1] : vector<16x16xf32> to vector<16xf32>
    %10 = vector.shape_cast %9 : vector<16xf32> to vector<16x1xf32>
    %11 = vector.broadcast %10 : vector<16x1xf32> to vector<16x16xf32>
    %12 = arith.subf %8, %11 : vector<16x16xf32>
    %13 = math.exp %12 : vector<16x16xf32>
    %cst_13 = arith.constant dense<0.000000e+00> : vector<16xf32>
    %14 = vector.multi_reduction <add>, %13, %cst_13 [1] : vector<16x16xf32> to vector<16xf32>
    %15 = vector.shape_cast %14 : vector<16xf32> to vector<16x1xf32>
    %16 = tpu.reciprocal %15 {approx = true} : vector<16x1xf32> -> vector<16x1xf32>
    %17 = vector.broadcast %16 : vector<16x1xf32> to vector<16x16xf32>
    %18 = arith.mulf %13, %17 : vector<16x16xf32>
    %cst_14 = arith.constant dense<0.000000e+00> : vector<16x8xf32>
    %19 = tpu.matmul %18, %5, %cst_14 {dimension_numbers = #tpu.dot_dimension_numbers<[1], [0], [0], [1], [0, 0, 1, 1], [], []>} : vector<16x16xf32>, vector<16x8xf32>, vector<16x8xf32> -> vector<16x8xf32>
    %c0_15 = arith.constant 0 : index
    %c0_16 = arith.constant 0 : index
    %c0_17 = arith.constant 0 : index
    %c0_18 = arith.constant 0 : index
    %20 = vector.load %arg5[%c0_15, %c0_16, %c0_17, %c0_18] : memref<1x1x16x8xf32, #tpu.memory_space<vmem>>, vector<1x1x16x8xf32>
    %21 = vector.shape_cast %20 : vector<1x1x16x8xf32> to vector<16x8xf32>
    %22 = vector.shape_cast %19 : vector<16x8xf32> to vector<1x1x16x8xf32>
    tpu.vector_store %arg5[%c0_15, %c0_16, %c0_17, %c0_18], %22 {strides = array<i32>} : memref<1x1x16x8xf32, #tpu.memory_space<vmem>>, vector<1x1x16x8xf32>,
    return
  }
  func.func @transform_0(%arg0: i32, %arg1: i32) -> (i32, i32, i32, i32) {
    %c0_i32 = arith.constant 0 : i32
    %c0_i32_0 = arith.constant 0 : i32
    %c0_i32_1 = arith.constant 0 : i32
    return %arg0, %arg1, %c0_i32, %c0_i32_0 : i32, i32, i32, i32
  }
  func.func @transform_1(%arg0: i32, %arg1: i32) -> (i32, i32, i32, i32) {
    %c0_i32 = arith.constant 0 : i32
    %c0_i32_0 = arith.constant 0 : i32
    %c0_i32_1 = arith.constant 0 : i32
    return %arg0, %arg1, %c0_i32, %c0_i32_0 : i32, i32, i32, i32
  }
  func.func @transform_2(%arg0: i32, %arg1: i32) -> (i32, i32, i32, i32) {
    %c0_i32 = arith.constant 0 : i32
    %c0_i32_0 = arith.constant 0 : i32
    %c0_i32_1 = arith.constant 0 : i32
    return %arg0, %arg1, %c0_i32, %c0_i32_0 : i32, i32, i32, i32
  }
  func.func @transform_3(%arg0: i32, %arg1: i32) -> (i32, i32, i32, i32) {
    %c0_i32 = arith.constant 0 : i32
    %c0_i32_0 = arith.constant 0 : i32
    %c0_i32_1 = arith.constant 0 : i32
    return %arg0, %arg1, %c0_i32, %c0_i32_0 : i32, i32, i32, i32
  }
}

module attributes {stable_mosaic.version = 11 : i64} {
  func.func @out_proj_kernel(%arg0: i32, %arg1: i32, %arg2: memref<1x16x32xf32, #tpu.memory_space<vmem>>, %arg3: memref<1x16x32xf32, #tpu.memory_space<vmem>>, %arg4: memref<32x32xf32, #tpu.memory_space<vmem>>, %arg5: memref<1x32xf32, #tpu.memory_space<vmem>>, %arg6: memref<1x16x32xf32, #tpu.memory_space<vmem>>) attributes {dimension_semantics = [#tpu.dimension_semantics<parallel>, #tpu.dimension_semantics<parallel>], iteration_bounds = array<i64: 2, 1>, scalar_prefetch = 0 : i64, scratch_operands = 0 : i64, tpu.core_type = #tpu.core_type<tc>, window_params = [{transform_indices = @transform_0, window_bounds = array<i64: 1, 16, 32>}, {transform_indices = @transform_1, window_bounds = array<i64: 1, 16, 32>}, {pipeline_mode = #tpu.pipeline_mode<synchronous>, transform_indices = @transform_2, window_bounds = array<i64: 32, 32>}, {pipeline_mode = #tpu.pipeline_mode<synchronous>, transform_indices = @transform_3, window_bounds = array<i64: 1, 32>}, {transform_indices = @transform_4, window_bounds = array<i64: 1, 16, 32>}]} {
    %c0 = arith.constant 0 : index
    %c0_0 = arith.constant 0 : index
    %c0_1 = arith.constant 0 : index
    %0 = vector.load %arg2[%c0, %c0_0, %c0_1] : memref<1x16x32xf32, #tpu.memory_space<vmem>>, vector<1x16x32xf32>
    %1 = vector.shape_cast %0 : vector<1x16x32xf32> to vector<16x32xf32>
    %c0_2 = arith.constant 0 : index
    %c0_3 = arith.constant 0 : index
    %2 = vector.load %arg4[%c0_2, %c0_3] : memref<32x32xf32, #tpu.memory_space<vmem>>, vector<32x32xf32>
    %cst = arith.constant dense<0.000000e+00> : vector<16x32xf32>
    %3 = tpu.matmul %1, %2, %cst {dimension_numbers = #tpu.dot_dimension_numbers<[1], [0], [0], [1], [0, 0, 1, 1], [], []>} : vector<16x32xf32>, vector<32x32xf32>, vector<16x32xf32> -> vector<16x32xf32>
    %c0_4 = arith.constant 0 : index
    %c0_5 = arith.constant 0 : index
    %4 = vector.load %arg5[%c0_4, %c0_5] : memref<1x32xf32, #tpu.memory_space<vmem>>, vector<1x32xf32>
    %5 = vector.broadcast %4 : vector<1x32xf32> to vector<16x32xf32>
    %6 = arith.addf %3, %5 : vector<16x32xf32>
    %c0_6 = arith.constant 0 : index
    %c0_7 = arith.constant 0 : index
    %c0_8 = arith.constant 0 : index
    %7 = vector.load %arg3[%c0_6, %c0_7, %c0_8] : memref<1x16x32xf32, #tpu.memory_space<vmem>>, vector<1x16x32xf32>
    %8 = vector.shape_cast %7 : vector<1x16x32xf32> to vector<16x32xf32>
    %9 = arith.addf %8, %6 : vector<16x32xf32>
    %c0_9 = arith.constant 0 : index
    %c0_10 = arith.constant 0 : index
    %c0_11 = arith.constant 0 : index
    %10 = vector.load %arg6[%c0_9, %c0_10, %c0_11] : memref<1x16x32xf32, #tpu.memory_space<vmem>>, vector<1x16x32xf32>
    %11 = vector.shape_cast %10 : vector<1x16x32xf32> to vector<16x32xf32>
    %12 = vector.shape_cast %9 : vector<16x32xf32> to vector<1x16x32xf32>
    tpu.vector_store %arg6[%c0_9, %c0_10, %c0_11], %12 {strides = array<i32>} : memref<1x16x32xf32, #tpu.memory_space<vmem>>, vector<1x16x32xf32>,
    return
  }
  func.func @transform_0(%arg0: i32, %arg1: i32) -> (i32, i32, i32) {
    %c0_i32 = arith.constant 0 : i32
    %c0_i32_0 = arith.constant 0 : i32
    return %arg0, %arg1, %c0_i32 : i32, i32, i32
  }
  func.func @transform_1(%arg0: i32, %arg1: i32) -> (i32, i32, i32) {
    %c0_i32 = arith.constant 0 : i32
    %c0_i32_0 = arith.constant 0 : i32
    return %arg0, %arg1, %c0_i32 : i32, i32, i32
  }
  func.func @transform_2(%arg0: i32, %arg1: i32) -> (i32, i32) {
    %c0_i32 = arith.constant 0 : i32
    %c0_i32_0 = arith.constant 0 : i32
    %c0_i32_1 = arith.constant 0 : i32
    return %c0_i32, %c0_i32_0 : i32, i32
  }
  func.func @transform_3(%arg0: i32, %arg1: i32) -> (i32, i32) {
    %c0_i32 = arith.constant 0 : i32
    %c0_i32_0 = arith.constant 0 : i32
    %c0_i32_1 = arith.constant 0 : i32
    return %c0_i32, %c0_i32_0 : i32, i32
  }
  func.func @transform_4(%arg0: i32, %arg1: i32) -> (i32, i32, i32) {
    %c0_i32 = arith.constant 0 : i32
    %c0_i32_0 = arith.constant 0 : i32
    return %arg0, %arg1, %c0_i32 : i32, i32, i32
  }
}

module attributes {stable_mosaic.version = 11 : i64} {
  func.func @mlp_ln_kernel(%arg0: i32, %arg1: i32, %arg2: i32, %arg3: memref<1x16x32xf32, #tpu.memory_space<vmem>>, %arg4: memref<32x64xf32, #tpu.memory_space<vmem>>, %arg5: memref<1x64xf32, #tpu.memory_space<vmem>>, %arg6: memref<64x32xf32, #tpu.memory_space<vmem>>, %arg7: memref<1x32xf32, #tpu.memory_space<vmem>>, %arg8: memref<1x32xf32, #tpu.memory_space<vmem>>, %arg9: memref<1x32xf32, #tpu.memory_space<vmem>>, %arg10: memref<1x16x32xf32, #tpu.memory_space<vmem>>, %arg11: memref<16x32xf32, #tpu.memory_space<vmem>>) attributes {dimension_semantics = [#tpu.dimension_semantics<parallel>, #tpu.dimension_semantics<parallel>, #tpu.dimension_semantics<arbitrary>], iteration_bounds = array<i64: 2, 1, 1>, scalar_prefetch = 0 : i64, scratch_operands = 1 : i64, tpu.core_type = #tpu.core_type<tc>, window_params = [{transform_indices = @transform_0, window_bounds = array<i64: 1, 16, 32>}, {transform_indices = @transform_1, window_bounds = array<i64: 32, 64>}, {transform_indices = @transform_2, window_bounds = array<i64: 1, 64>}, {transform_indices = @transform_3, window_bounds = array<i64: 64, 32>}, {pipeline_mode = #tpu.pipeline_mode<synchronous>, transform_indices = @transform_4, window_bounds = array<i64: 1, 32>}, {pipeline_mode = #tpu.pipeline_mode<synchronous>, transform_indices = @transform_5, window_bounds = array<i64: 1, 32>}, {pipeline_mode = #tpu.pipeline_mode<synchronous>, transform_indices = @transform_6, window_bounds = array<i64: 1, 32>}, {transform_indices = @transform_7, window_bounds = array<i64: 1, 16, 32>}]} {
    %c0_i32 = arith.constant 0 : i32
    %0 = arith.cmpi eq, %arg2, %c0_i32 : i32
    %1 = arith.extui %0 : i1 to i32
    %c0_i32_0 = arith.constant 0 : i32
    %2 = arith.cmpi ne, %1, %c0_i32_0 : i32
    scf.if %2 {
      %cst_20 = arith.constant 0.000000e+00 : f32
      %31 = vector.broadcast %cst_20 : f32 to vector<16x32xf32>
      %c0_21 = arith.constant 0 : index
      %c0_22 = arith.constant 0 : index
      %32 = vector.load %arg11[%c0_21, %c0_22] : memref<16x32xf32, #tpu.memory_space<vmem>>, vector<16x32xf32>
      tpu.vector_store %arg11[%c0_21, %c0_22], %31 {strides = array<i32>} : memref<16x32xf32, #tpu.memory_space<vmem>>, vector<16x32xf32>,
    } else {
    }
    %c0 = arith.constant 0 : index
    %c0_1 = arith.constant 0 : index
    %c0_2 = arith.constant 0 : index
    %3 = vector.load %arg3[%c0, %c0_1, %c0_2] : memref<1x16x32xf32, #tpu.memory_space<vmem>>, vector<1x16x32xf32>
    %4 = vector.shape_cast %3 : vector<1x16x32xf32> to vector<16x32xf32>
    %c0_3 = arith.constant 0 : index
    %c0_4 = arith.constant 0 : index
    %5 = vector.load %arg4[%c0_3, %c0_4] : memref<32x64xf32, #tpu.memory_space<vmem>>, vector<32x64xf32>
    %cst = arith.constant dense<0.000000e+00> : vector<16x64xf32>
    %6 = tpu.matmul %4, %5, %cst {dimension_numbers = #tpu.dot_dimension_numbers<[1], [0], [0], [1], [0, 0, 1, 1], [], []>} : vector<16x32xf32>, vector<32x64xf32>, vector<16x64xf32> -> vector<16x64xf32>
    %c0_5 = arith.constant 0 : index
    %c0_6 = arith.constant 0 : index
    %7 = vector.load %arg5[%c0_5, %c0_6] : memref<1x64xf32, #tpu.memory_space<vmem>>, vector<1x64xf32>
    %8 = vector.broadcast %7 : vector<1x64xf32> to vector<16x64xf32>
    %9 = arith.addf %6, %8 : vector<16x64xf32>
    %cst_7 = arith.constant 5.000000e-01 : f32
    %10 = vector.broadcast %cst_7 : f32 to vector<16x64xf32>
    %11 = arith.mulf %10, %9 : vector<16x64xf32>
    %cst_8 = arith.constant 4.471500e-02 : f32
    %12 = vector.broadcast %cst_8 : f32 to vector<16x64xf32>
    %13 = arith.mulf %12, %9 : vector<16x64xf32>
    %14 = arith.mulf %13, %9 : vector<16x64xf32>
    %15 = arith.mulf %14, %9 : vector<16x64xf32>
    %16 = arith.addf %9, %15 : vector<16x64xf32>
    %cst_9 = arith.constant 0.797884583 : f32
    %17 = vector.broadcast %cst_9 : f32 to vector<16x64xf32>
    %18 = arith.mulf %17, %16 : vector<16x64xf32>
    %19 = math.tanh %18 : vector<16x64xf32>
    %cst_10 = arith.constant 1.000000e+00 : f32
    %20 = vector.broadcast %cst_10 : f32 to vector<16x64xf32>
    %21 = arith.addf %20, %19 : vector<16x64xf32>
    %22 = arith.mulf %11, %21 : vector<16x64xf32>
    %c0_11 = arith.constant 0 : index
    %c0_12 = arith.constant 0 : index
    %23 = vector.load %arg11[%c0_11, %c0_12] : memref<16x32xf32, #tpu.memory_space<vmem>>, vector<16x32xf32>
    %c0_13 = arith.constant 0 : index
    %c0_14 = arith.constant 0 : index
    %24 = vector.load %arg6[%c0_13, %c0_14] : memref<64x32xf32, #tpu.memory_space<vmem>>, vector<64x32xf32>
    %cst_15 = arith.constant dense<0.000000e+00> : vector<16x32xf32>
    %25 = tpu.matmul %22, %24, %cst_15 {dimension_numbers = #tpu.dot_dimension_numbers<[1], [0], [0], [1], [0, 0, 1, 1], [], []>} : vector<16x64xf32>, vector<64x32xf32>, vector<16x32xf32> -> vector<16x32xf32>
    %26 = arith.addf %23, %25 : vector<16x32xf32>
    %c0_16 = arith.constant 0 : index
    %c0_17 = arith.constant 0 : index
    %27 = vector.load %arg11[%c0_16, %c0_17] : memref<16x32xf32, #tpu.memory_space<vmem>>, vector<16x32xf32>
    tpu.vector_store %arg11[%c0_16, %c0_17], %26 {strides = array<i32>} : memref<16x32xf32, #tpu.memory_space<vmem>>, vector<16x32xf32>,
    %c0_i32_18 = arith.constant 0 : i32
    %28 = arith.cmpi eq, %arg2, %c0_i32_18 : i32
    %29 = arith.extui %28 : i1 to i32
    %c0_i32_19 = arith.constant 0 : i32
    %30 = arith.cmpi ne, %29, %c0_i32_19 : i32
    scf.if %30 {
      %c0_20 = arith.constant 0 : index
      %c0_21 = arith.constant 0 : index
      %31 = vector.load %arg11[%c0_20, %c0_21] : memref<16x32xf32, #tpu.memory_space<vmem>>, vector<16x32xf32>
      %c0_22 = arith.constant 0 : index
      %c0_23 = arith.constant 0 : index
      %32 = vector.load %arg7[%c0_22, %c0_23] : memref<1x32xf32, #tpu.memory_space<vmem>>, vector<1x32xf32>
      %33 = vector.broadcast %32 : vector<1x32xf32> to vector<16x32xf32>
      %34 = arith.addf %31, %33 : vector<16x32xf32>
      %c0_24 = arith.constant 0 : index
      %c0_25 = arith.constant 0 : index
      %35 = vector.load %arg8[%c0_24, %c0_25] : memref<1x32xf32, #tpu.memory_space<vmem>>, vector<1x32xf32>
      %c0_26 = arith.constant 0 : index
      %c0_27 = arith.constant 0 : index
      %36 = vector.load %arg9[%c0_26, %c0_27] : memref<1x32xf32, #tpu.memory_space<vmem>>, vector<1x32xf32>
      %cst_28 = arith.constant dense<0.000000e+00> : vector<16xf32>
      %37 = vector.multi_reduction <add>, %34, %cst_28 [1] : vector<16x32xf32> to vector<16xf32>
      %38 = vector.shape_cast %37 : vector<16xf32> to vector<16x1xf32>
      %cst_29 = arith.constant 3.200000e+01 : f32
      %39 = vector.broadcast %cst_29 : f32 to vector<16x1xf32>
      %40 = arith.divf %38, %39 : vector<16x1xf32>
      %41 = vector.broadcast %40 : vector<16x1xf32> to vector<16x32xf32>
      %42 = arith.subf %34, %41 : vector<16x32xf32>
      %43 = arith.mulf %42, %42 : vector<16x32xf32>
      %cst_30 = arith.constant dense<0.000000e+00> : vector<16xf32>
      %44 = vector.multi_reduction <add>, %43, %cst_30 [1] : vector<16x32xf32> to vector<16xf32>
      %45 = vector.shape_cast %44 : vector<16xf32> to vector<16x1xf32>
      %cst_31 = arith.constant 3.200000e+01 : f32
      %46 = vector.broadcast %cst_31 : f32 to vector<16x1xf32>
      %47 = arith.divf %45, %46 : vector<16x1xf32>
      %cst_32 = arith.constant 9.99999997E-7 : f32
      %48 = vector.broadcast %cst_32 : f32 to vector<16x1xf32>
      %49 = arith.addf %47, %48 : vector<16x1xf32>
      %50 = math.rsqrt %49 : vector<16x1xf32>
      %51 = vector.broadcast %50 : vector<16x1xf32> to vector<16x32xf32>
      %52 = arith.mulf %42, %51 : vector<16x32xf32>
      %53 = vector.broadcast %35 : vector<1x32xf32> to vector<16x32xf32>
      %54 = arith.mulf %52, %53 : vector<16x32xf32>
      %55 = vector.broadcast %36 : vector<1x32xf32> to vector<16x32xf32>
      %56 = arith.addf %54, %55 : vector<16x32xf32>
      %c0_33 = arith.constant 0 : index
      %c0_34 = arith.constant 0 : index
      %c0_35 = arith.constant 0 : index
      %57 = vector.load %arg10[%c0_33, %c0_34, %c0_35] : memref<1x16x32xf32, #tpu.memory_space<vmem>>, vector<1x16x32xf32>
      %58 = vector.shape_cast %57 : vector<1x16x32xf32> to vector<16x32xf32>
      %59 = vector.shape_cast %56 : vector<16x32xf32> to vector<1x16x32xf32>
      tpu.vector_store %arg10[%c0_33, %c0_34, %c0_35], %59 {strides = array<i32>} : memref<1x16x32xf32, #tpu.memory_space<vmem>>, vector<1x16x32xf32>,
    } else {
    }
    return
  }
  func.func @transform_0(%arg0: i32, %arg1: i32, %arg2: i32) -> (i32, i32, i32) {
    %c0_i32 = arith.constant 0 : i32
    %c0_i32_0 = arith.constant 0 : i32
    return %arg0, %arg1, %c0_i32 : i32, i32, i32
  }
  func.func @transform_1(%arg0: i32, %arg1: i32, %arg2: i32) -> (i32, i32) {
    %c0_i32 = arith.constant 0 : i32
    %c0_i32_0 = arith.constant 0 : i32
    return %c0_i32, %arg2 : i32, i32
  }
  func.func @transform_2(%arg0: i32, %arg1: i32, %arg2: i32) -> (i32, i32) {
    %c0_i32 = arith.constant 0 : i32
    %c0_i32_0 = arith.constant 0 : i32
    return %c0_i32, %arg2 : i32, i32
  }
  func.func @transform_3(%arg0: i32, %arg1: i32, %arg2: i32) -> (i32, i32) {
    %c0_i32 = arith.constant 0 : i32
    %c0_i32_0 = arith.constant 0 : i32
    return %arg2, %c0_i32 : i32, i32
  }
  func.func @transform_4(%arg0: i32, %arg1: i32, %arg2: i32) -> (i32, i32) {
    %c0_i32 = arith.constant 0 : i32
    %c0_i32_0 = arith.constant 0 : i32
    %c0_i32_1 = arith.constant 0 : i32
    return %c0_i32, %c0_i32_0 : i32, i32
  }
  func.func @transform_5(%arg0: i32, %arg1: i32, %arg2: i32) -> (i32, i32) {
    %c0_i32 = arith.constant 0 : i32
    %c0_i32_0 = arith.constant 0 : i32
    %c0_i32_1 = arith.constant 0 : i32
    return %c0_i32, %c0_i32_0 : i32, i32
  }
  func.func @transform_6(%arg0: i32, %arg1: i32, %arg2: i32) -> (i32, i32) {
    %c0_i32 = arith.constant 0 : i32
    %c0_i32_0 = arith.constant 0 : i32
    %c0_i32_1 = arith.constant 0 : i32
    return %c0_i32, %c0_i32_0 : i32, i32
  }
  func.func @transform_7(%arg0: i32, %arg1: i32, %arg2: i32) -> (i32, i32, i32) {
    %c0_i32 = arith.constant 0 : i32
    %c0_i32_0 = arith.constant 0 : i32
    return %arg0, %arg1, %c0_i32 : i32, i32, i32
  }
}

module attributes {stable_mosaic.version = 11 : i64} {
  func.func @mlp_res_kernel(%arg0: i32, %arg1: i32, %arg2: i32, %arg3: memref<1x16x32xf32, #tpu.memory_space<vmem>>, %arg4: memref<1x16x32xf32, #tpu.memory_space<vmem>>, %arg5: memref<32x64xf32, #tpu.memory_space<vmem>>, %arg6: memref<1x64xf32, #tpu.memory_space<vmem>>, %arg7: memref<64x32xf32, #tpu.memory_space<vmem>>, %arg8: memref<1x32xf32, #tpu.memory_space<vmem>>, %arg9: memref<1x32xf32, #tpu.memory_space<vmem>>, %arg10: memref<1x32xf32, #tpu.memory_space<vmem>>, %arg11: memref<1x16x32xf32, #tpu.memory_space<vmem>>, %arg12: memref<16x32xf32, #tpu.memory_space<vmem>>) attributes {dimension_semantics = [#tpu.dimension_semantics<parallel>, #tpu.dimension_semantics<parallel>, #tpu.dimension_semantics<arbitrary>], iteration_bounds = array<i64: 2, 1, 1>, scalar_prefetch = 0 : i64, scratch_operands = 1 : i64, tpu.core_type = #tpu.core_type<tc>, window_params = [{transform_indices = @transform_0, window_bounds = array<i64: 1, 16, 32>}, {transform_indices = @transform_1, window_bounds = array<i64: 1, 16, 32>}, {transform_indices = @transform_2, window_bounds = array<i64: 32, 64>}, {transform_indices = @transform_3, window_bounds = array<i64: 1, 64>}, {transform_indices = @transform_4, window_bounds = array<i64: 64, 32>}, {pipeline_mode = #tpu.pipeline_mode<synchronous>, transform_indices = @transform_5, window_bounds = array<i64: 1, 32>}, {pipeline_mode = #tpu.pipeline_mode<synchronous>, transform_indices = @transform_6, window_bounds = array<i64: 1, 32>}, {pipeline_mode = #tpu.pipeline_mode<synchronous>, transform_indices = @transform_7, window_bounds = array<i64: 1, 32>}, {transform_indices = @transform_8, window_bounds = array<i64: 1, 16, 32>}]} {
    %c0_i32 = arith.constant 0 : i32
    %0 = arith.cmpi eq, %arg2, %c0_i32 : i32
    %1 = arith.extui %0 : i1 to i32
    %c0_i32_0 = arith.constant 0 : i32
    %2 = arith.cmpi ne, %1, %c0_i32_0 : i32
    scf.if %2 {
      %cst_20 = arith.constant 0.000000e+00 : f32
      %31 = vector.broadcast %cst_20 : f32 to vector<16x32xf32>
      %c0_21 = arith.constant 0 : index
      %c0_22 = arith.constant 0 : index
      %32 = vector.load %arg12[%c0_21, %c0_22] : memref<16x32xf32, #tpu.memory_space<vmem>>, vector<16x32xf32>
      tpu.vector_store %arg12[%c0_21, %c0_22], %31 {strides = array<i32>} : memref<16x32xf32, #tpu.memory_space<vmem>>, vector<16x32xf32>,
    } else {
    }
    %c0 = arith.constant 0 : index
    %c0_1 = arith.constant 0 : index
    %c0_2 = arith.constant 0 : index
    %3 = vector.load %arg3[%c0, %c0_1, %c0_2] : memref<1x16x32xf32, #tpu.memory_space<vmem>>, vector<1x16x32xf32>
    %4 = vector.shape_cast %3 : vector<1x16x32xf32> to vector<16x32xf32>
    %c0_3 = arith.constant 0 : index
    %c0_4 = arith.constant 0 : index
    %5 = vector.load %arg5[%c0_3, %c0_4] : memref<32x64xf32, #tpu.memory_space<vmem>>, vector<32x64xf32>
    %cst = arith.constant dense<0.000000e+00> : vector<16x64xf32>
    %6 = tpu.matmul %4, %5, %cst {dimension_numbers = #tpu.dot_dimension_numbers<[1], [0], [0], [1], [0, 0, 1, 1], [], []>} : vector<16x32xf32>, vector<32x64xf32>, vector<16x64xf32> -> vector<16x64xf32>
    %c0_5 = arith.constant 0 : index
    %c0_6 = arith.constant 0 : index
    %7 = vector.load %arg6[%c0_5, %c0_6] : memref<1x64xf32, #tpu.memory_space<vmem>>, vector<1x64xf32>
    %8 = vector.broadcast %7 : vector<1x64xf32> to vector<16x64xf32>
    %9 = arith.addf %6, %8 : vector<16x64xf32>
    %cst_7 = arith.constant 5.000000e-01 : f32
    %10 = vector.broadcast %cst_7 : f32 to vector<16x64xf32>
    %11 = arith.mulf %10, %9 : vector<16x64xf32>
    %cst_8 = arith.constant 4.471500e-02 : f32
    %12 = vector.broadcast %cst_8 : f32 to vector<16x64xf32>
    %13 = arith.mulf %12, %9 : vector<16x64xf32>
    %14 = arith.mulf %13, %9 : vector<16x64xf32>
    %15 = arith.mulf %14, %9 : vector<16x64xf32>
    %16 = arith.addf %9, %15 : vector<16x64xf32>
    %cst_9 = arith.constant 0.797884583 : f32
    %17 = vector.broadcast %cst_9 : f32 to vector<16x64xf32>
    %18 = arith.mulf %17, %16 : vector<16x64xf32>
    %19 = math.tanh %18 : vector<16x64xf32>
    %cst_10 = arith.constant 1.000000e+00 : f32
    %20 = vector.broadcast %cst_10 : f32 to vector<16x64xf32>
    %21 = arith.addf %20, %19 : vector<16x64xf32>
    %22 = arith.mulf %11, %21 : vector<16x64xf32>
    %c0_11 = arith.constant 0 : index
    %c0_12 = arith.constant 0 : index
    %23 = vector.load %arg12[%c0_11, %c0_12] : memref<16x32xf32, #tpu.memory_space<vmem>>, vector<16x32xf32>
    %c0_13 = arith.constant 0 : index
    %c0_14 = arith.constant 0 : index
    %24 = vector.load %arg7[%c0_13, %c0_14] : memref<64x32xf32, #tpu.memory_space<vmem>>, vector<64x32xf32>
    %cst_15 = arith.constant dense<0.000000e+00> : vector<16x32xf32>
    %25 = tpu.matmul %22, %24, %cst_15 {dimension_numbers = #tpu.dot_dimension_numbers<[1], [0], [0], [1], [0, 0, 1, 1], [], []>} : vector<16x64xf32>, vector<64x32xf32>, vector<16x32xf32> -> vector<16x32xf32>
    %26 = arith.addf %23, %25 : vector<16x32xf32>
    %c0_16 = arith.constant 0 : index
    %c0_17 = arith.constant 0 : index
    %27 = vector.load %arg12[%c0_16, %c0_17] : memref<16x32xf32, #tpu.memory_space<vmem>>, vector<16x32xf32>
    tpu.vector_store %arg12[%c0_16, %c0_17], %26 {strides = array<i32>} : memref<16x32xf32, #tpu.memory_space<vmem>>, vector<16x32xf32>,
    %c0_i32_18 = arith.constant 0 : i32
    %28 = arith.cmpi eq, %arg2, %c0_i32_18 : i32
    %29 = arith.extui %28 : i1 to i32
    %c0_i32_19 = arith.constant 0 : i32
    %30 = arith.cmpi ne, %29, %c0_i32_19 : i32
    scf.if %30 {
      %c0_20 = arith.constant 0 : index
      %c0_21 = arith.constant 0 : index
      %c0_22 = arith.constant 0 : index
      %31 = vector.load %arg4[%c0_20, %c0_21, %c0_22] : memref<1x16x32xf32, #tpu.memory_space<vmem>>, vector<1x16x32xf32>
      %32 = vector.shape_cast %31 : vector<1x16x32xf32> to vector<16x32xf32>
      %c0_23 = arith.constant 0 : index
      %c0_24 = arith.constant 0 : index
      %33 = vector.load %arg12[%c0_23, %c0_24] : memref<16x32xf32, #tpu.memory_space<vmem>>, vector<16x32xf32>
      %34 = arith.addf %32, %33 : vector<16x32xf32>
      %c0_25 = arith.constant 0 : index
      %c0_26 = arith.constant 0 : index
      %35 = vector.load %arg8[%c0_25, %c0_26] : memref<1x32xf32, #tpu.memory_space<vmem>>, vector<1x32xf32>
      %36 = vector.broadcast %35 : vector<1x32xf32> to vector<16x32xf32>
      %37 = arith.addf %34, %36 : vector<16x32xf32>
      %c0_27 = arith.constant 0 : index
      %c0_28 = arith.constant 0 : index
      %c0_29 = arith.constant 0 : index
      %38 = vector.load %arg11[%c0_27, %c0_28, %c0_29] : memref<1x16x32xf32, #tpu.memory_space<vmem>>, vector<1x16x32xf32>
      %39 = vector.shape_cast %38 : vector<1x16x32xf32> to vector<16x32xf32>
      %40 = vector.shape_cast %37 : vector<16x32xf32> to vector<1x16x32xf32>
      tpu.vector_store %arg11[%c0_27, %c0_28, %c0_29], %40 {strides = array<i32>} : memref<1x16x32xf32, #tpu.memory_space<vmem>>, vector<1x16x32xf32>,
    } else {
    }
    return
  }
  func.func @transform_0(%arg0: i32, %arg1: i32, %arg2: i32) -> (i32, i32, i32) {
    %c0_i32 = arith.constant 0 : i32
    %c0_i32_0 = arith.constant 0 : i32
    return %arg0, %arg1, %c0_i32 : i32, i32, i32
  }
  func.func @transform_1(%arg0: i32, %arg1: i32, %arg2: i32) -> (i32, i32, i32) {
    %c0_i32 = arith.constant 0 : i32
    %c0_i32_0 = arith.constant 0 : i32
    return %arg0, %arg1, %c0_i32 : i32, i32, i32
  }
  func.func @transform_2(%arg0: i32, %arg1: i32, %arg2: i32) -> (i32, i32) {
    %c0_i32 = arith.constant 0 : i32
    %c0_i32_0 = arith.constant 0 : i32
    return %c0_i32, %arg2 : i32, i32
  }
  func.func @transform_3(%arg0: i32, %arg1: i32, %arg2: i32) -> (i32, i32) {
    %c0_i32 = arith.constant 0 : i32
    %c0_i32_0 = arith.constant 0 : i32
    return %c0_i32, %arg2 : i32, i32
  }
  func.func @transform_4(%arg0: i32, %arg1: i32, %arg2: i32) -> (i32, i32) {
    %c0_i32 = arith.constant 0 : i32
    %c0_i32_0 = arith.constant 0 : i32
    return %arg2, %c0_i32 : i32, i32
  }
  func.func @transform_5(%arg0: i32, %arg1: i32, %arg2: i32) -> (i32, i32) {
    %c0_i32 = arith.constant 0 : i32
    %c0_i32_0 = arith.constant 0 : i32
    %c0_i32_1 = arith.constant 0 : i32
    return %c0_i32, %c0_i32_0 : i32, i32
  }
  func.func @transform_6(%arg0: i32, %arg1: i32, %arg2: i32) -> (i32, i32) {
    %c0_i32 = arith.constant 0 : i32
    %c0_i32_0 = arith.constant 0 : i32
    %c0_i32_1 = arith.constant 0 : i32
    return %c0_i32, %c0_i32_0 : i32, i32
  }
  func.func @transform_7(%arg0: i32, %arg1: i32, %arg2: i32) -> (i32, i32) {
    %c0_i32 = arith.constant 0 : i32
    %c0_i32_0 = arith.constant 0 : i32
    %c0_i32_1 = arith.constant 0 : i32
    return %c0_i32, %c0_i32_0 : i32, i32
  }
  func.func @transform_8(%arg0: i32, %arg1: i32, %arg2: i32) -> (i32, i32, i32) {
    %c0_i32 = arith.constant 0 : i32
    %c0_i32_0 = arith.constant 0 : i32
    return %arg0, %arg1, %c0_i32 : i32, i32, i32
  }
}

module attributes {stable_mosaic.version = 11 : i64} {
  func.func @mlp_res_kernel(%arg0: i32, %arg1: i32, %arg2: i32, %arg3: memref<1x16x32xf32, #tpu.memory_space<vmem>>, %arg4: memref<1x16x32xf32, #tpu.memory_space<vmem>>, %arg5: memref<32x64xf32, #tpu.memory_space<vmem>>, %arg6: memref<1x64xf32, #tpu.memory_space<vmem>>, %arg7: memref<64x32xf32, #tpu.memory_space<vmem>>, %arg8: memref<1x32xf32, #tpu.memory_space<vmem>>, %arg9: memref<1x32xf32, #tpu.memory_space<vmem>>, %arg10: memref<1x32xf32, #tpu.memory_space<vmem>>, %arg11: memref<1x16x32xf32, #tpu.memory_space<vmem>>, %arg12: memref<16x32xf32, #tpu.memory_space<vmem>>) attributes {dimension_semantics = [#tpu.dimension_semantics<parallel>, #tpu.dimension_semantics<parallel>, #tpu.dimension_semantics<arbitrary>], iteration_bounds = array<i64: 2, 1, 1>, scalar_prefetch = 0 : i64, scratch_operands = 1 : i64, tpu.core_type = #tpu.core_type<tc>, window_params = [{transform_indices = @transform_0, window_bounds = array<i64: 1, 16, 32>}, {transform_indices = @transform_1, window_bounds = array<i64: 1, 16, 32>}, {transform_indices = @transform_2, window_bounds = array<i64: 32, 64>}, {transform_indices = @transform_3, window_bounds = array<i64: 1, 64>}, {transform_indices = @transform_4, window_bounds = array<i64: 64, 32>}, {pipeline_mode = #tpu.pipeline_mode<synchronous>, transform_indices = @transform_5, window_bounds = array<i64: 1, 32>}, {pipeline_mode = #tpu.pipeline_mode<synchronous>, transform_indices = @transform_6, window_bounds = array<i64: 1, 32>}, {pipeline_mode = #tpu.pipeline_mode<synchronous>, transform_indices = @transform_7, window_bounds = array<i64: 1, 32>}, {transform_indices = @transform_8, window_bounds = array<i64: 1, 16, 32>}]} {
    %c0_i32 = arith.constant 0 : i32
    %0 = arith.cmpi eq, %arg2, %c0_i32 : i32
    %1 = arith.extui %0 : i1 to i32
    %c0_i32_0 = arith.constant 0 : i32
    %2 = arith.cmpi ne, %1, %c0_i32_0 : i32
    scf.if %2 {
      %cst_20 = arith.constant 0.000000e+00 : f32
      %31 = vector.broadcast %cst_20 : f32 to vector<16x32xf32>
      %c0_21 = arith.constant 0 : index
      %c0_22 = arith.constant 0 : index
      %32 = vector.load %arg12[%c0_21, %c0_22] : memref<16x32xf32, #tpu.memory_space<vmem>>, vector<16x32xf32>
      tpu.vector_store %arg12[%c0_21, %c0_22], %31 {strides = array<i32>} : memref<16x32xf32, #tpu.memory_space<vmem>>, vector<16x32xf32>,
    } else {
    }
    %c0 = arith.constant 0 : index
    %c0_1 = arith.constant 0 : index
    %c0_2 = arith.constant 0 : index
    %3 = vector.load %arg3[%c0, %c0_1, %c0_2] : memref<1x16x32xf32, #tpu.memory_space<vmem>>, vector<1x16x32xf32>
    %4 = vector.shape_cast %3 : vector<1x16x32xf32> to vector<16x32xf32>
    %c0_3 = arith.constant 0 : index
    %c0_4 = arith.constant 0 : index
    %5 = vector.load %arg5[%c0_3, %c0_4] : memref<32x64xf32, #tpu.memory_space<vmem>>, vector<32x64xf32>
    %cst = arith.constant dense<0.000000e+00> : vector<16x64xf32>
    %6 = tpu.matmul %4, %5, %cst {dimension_numbers = #tpu.dot_dimension_numbers<[1], [0], [0], [1], [0, 0, 1, 1], [], []>} : vector<16x32xf32>, vector<32x64xf32>, vector<16x64xf32> -> vector<16x64xf32>
    %c0_5 = arith.constant 0 : index
    %c0_6 = arith.constant 0 : index
    %7 = vector.load %arg6[%c0_5, %c0_6] : memref<1x64xf32, #tpu.memory_space<vmem>>, vector<1x64xf32>
    %8 = vector.broadcast %7 : vector<1x64xf32> to vector<16x64xf32>
    %9 = arith.addf %6, %8 : vector<16x64xf32>
    %cst_7 = arith.constant 5.000000e-01 : f32
    %10 = vector.broadcast %cst_7 : f32 to vector<16x64xf32>
    %11 = arith.mulf %10, %9 : vector<16x64xf32>
    %cst_8 = arith.constant 4.471500e-02 : f32
    %12 = vector.broadcast %cst_8 : f32 to vector<16x64xf32>
    %13 = arith.mulf %12, %9 : vector<16x64xf32>
    %14 = arith.mulf %13, %9 : vector<16x64xf32>
    %15 = arith.mulf %14, %9 : vector<16x64xf32>
    %16 = arith.addf %9, %15 : vector<16x64xf32>
    %cst_9 = arith.constant 0.797884583 : f32
    %17 = vector.broadcast %cst_9 : f32 to vector<16x64xf32>
    %18 = arith.mulf %17, %16 : vector<16x64xf32>
    %19 = math.tanh %18 : vector<16x64xf32>
    %cst_10 = arith.constant 1.000000e+00 : f32
    %20 = vector.broadcast %cst_10 : f32 to vector<16x64xf32>
    %21 = arith.addf %20, %19 : vector<16x64xf32>
    %22 = arith.mulf %11, %21 : vector<16x64xf32>
    %c0_11 = arith.constant 0 : index
    %c0_12 = arith.constant 0 : index
    %23 = vector.load %arg12[%c0_11, %c0_12] : memref<16x32xf32, #tpu.memory_space<vmem>>, vector<16x32xf32>
    %c0_13 = arith.constant 0 : index
    %c0_14 = arith.constant 0 : index
    %24 = vector.load %arg7[%c0_13, %c0_14] : memref<64x32xf32, #tpu.memory_space<vmem>>, vector<64x32xf32>
    %cst_15 = arith.constant dense<0.000000e+00> : vector<16x32xf32>
    %25 = tpu.matmul %22, %24, %cst_15 {dimension_numbers = #tpu.dot_dimension_numbers<[1], [0], [0], [1], [0, 0, 1, 1], [], []>} : vector<16x64xf32>, vector<64x32xf32>, vector<16x32xf32> -> vector<16x32xf32>
    %26 = arith.addf %23, %25 : vector<16x32xf32>
    %c0_16 = arith.constant 0 : index
    %c0_17 = arith.constant 0 : index
    %27 = vector.load %arg12[%c0_16, %c0_17] : memref<16x32xf32, #tpu.memory_space<vmem>>, vector<16x32xf32>
    tpu.vector_store %arg12[%c0_16, %c0_17], %26 {strides = array<i32>} : memref<16x32xf32, #tpu.memory_space<vmem>>, vector<16x32xf32>,
    %c0_i32_18 = arith.constant 0 : i32
    %28 = arith.cmpi eq, %arg2, %c0_i32_18 : i32
    %29 = arith.extui %28 : i1 to i32
    %c0_i32_19 = arith.constant 0 : i32
    %30 = arith.cmpi ne, %29, %c0_i32_19 : i32
    scf.if %30 {
      %c0_20 = arith.constant 0 : index
      %c0_21 = arith.constant 0 : index
      %c0_22 = arith.constant 0 : index
      %31 = vector.load %arg4[%c0_20, %c0_21, %c0_22] : memref<1x16x32xf32, #tpu.memory_space<vmem>>, vector<1x16x32xf32>
      %32 = vector.shape_cast %31 : vector<1x16x32xf32> to vector<16x32xf32>
      %c0_23 = arith.constant 0 : index
      %c0_24 = arith.constant 0 : index
      %33 = vector.load %arg12[%c0_23, %c0_24] : memref<16x32xf32, #tpu.memory_space<vmem>>, vector<16x32xf32>
      %34 = arith.addf %32, %33 : vector<16x32xf32>
      %c0_25 = arith.constant 0 : index
      %c0_26 = arith.constant 0 : index
      %35 = vector.load %arg8[%c0_25, %c0_26] : memref<1x32xf32, #tpu.memory_space<vmem>>, vector<1x32xf32>
      %36 = vector.broadcast %35 : vector<1x32xf32> to vector<16x32xf32>
      %37 = arith.addf %34, %36 : vector<16x32xf32>
      %c0_27 = arith.constant 0 : index
      %c0_28 = arith.constant 0 : index
      %38 = vector.load %arg9[%c0_27, %c0_28] : memref<1x32xf32, #tpu.memory_space<vmem>>, vector<1x32xf32>
      %c0_29 = arith.constant 0 : index
      %c0_30 = arith.constant 0 : index
      %39 = vector.load %arg10[%c0_29, %c0_30] : memref<1x32xf32, #tpu.memory_space<vmem>>, vector<1x32xf32>
      %cst_31 = arith.constant dense<0.000000e+00> : vector<16xf32>
      %40 = vector.multi_reduction <add>, %37, %cst_31 [1] : vector<16x32xf32> to vector<16xf32>
      %41 = vector.shape_cast %40 : vector<16xf32> to vector<16x1xf32>
      %cst_32 = arith.constant 3.200000e+01 : f32
      %42 = vector.broadcast %cst_32 : f32 to vector<16x1xf32>
      %43 = arith.divf %41, %42 : vector<16x1xf32>
      %44 = vector.broadcast %43 : vector<16x1xf32> to vector<16x32xf32>
      %45 = arith.subf %37, %44 : vector<16x32xf32>
      %46 = arith.mulf %45, %45 : vector<16x32xf32>
      %cst_33 = arith.constant dense<0.000000e+00> : vector<16xf32>
      %47 = vector.multi_reduction <add>, %46, %cst_33 [1] : vector<16x32xf32> to vector<16xf32>
      %48 = vector.shape_cast %47 : vector<16xf32> to vector<16x1xf32>
      %cst_34 = arith.constant 3.200000e+01 : f32
      %49 = vector.broadcast %cst_34 : f32 to vector<16x1xf32>
      %50 = arith.divf %48, %49 : vector<16x1xf32>
      %cst_35 = arith.constant 9.99999997E-7 : f32
      %51 = vector.broadcast %cst_35 : f32 to vector<16x1xf32>
      %52 = arith.addf %50, %51 : vector<16x1xf32>
      %53 = math.rsqrt %52 : vector<16x1xf32>
      %54 = vector.broadcast %53 : vector<16x1xf32> to vector<16x32xf32>
      %55 = arith.mulf %45, %54 : vector<16x32xf32>
      %56 = vector.broadcast %38 : vector<1x32xf32> to vector<16x32xf32>
      %57 = arith.mulf %55, %56 : vector<16x32xf32>
      %58 = vector.broadcast %39 : vector<1x32xf32> to vector<16x32xf32>
      %59 = arith.addf %57, %58 : vector<16x32xf32>
      %c0_36 = arith.constant 0 : index
      %c0_37 = arith.constant 0 : index
      %c0_38 = arith.constant 0 : index
      %60 = vector.load %arg11[%c0_36, %c0_37, %c0_38] : memref<1x16x32xf32, #tpu.memory_space<vmem>>, vector<1x16x32xf32>
      %61 = vector.shape_cast %60 : vector<1x16x32xf32> to vector<16x32xf32>
      %62 = vector.shape_cast %59 : vector<16x32xf32> to vector<1x16x32xf32>
      tpu.vector_store %arg11[%c0_36, %c0_37, %c0_38], %62 {strides = array<i32>} : memref<1x16x32xf32, #tpu.memory_space<vmem>>, vector<1x16x32xf32>,
    } else {
    }
    return
  }
  func.func @transform_0(%arg0: i32, %arg1: i32, %arg2: i32) -> (i32, i32, i32) {
    %c0_i32 = arith.constant 0 : i32
    %c0_i32_0 = arith.constant 0 : i32
    return %arg0, %arg1, %c0_i32 : i32, i32, i32
  }
  func.func @transform_1(%arg0: i32, %arg1: i32, %arg2: i32) -> (i32, i32, i32) {
    %c0_i32 = arith.constant 0 : i32
    %c0_i32_0 = arith.constant 0 : i32
    return %arg0, %arg1, %c0_i32 : i32, i32, i32
  }
  func.func @transform_2(%arg0: i32, %arg1: i32, %arg2: i32) -> (i32, i32) {
    %c0_i32 = arith.constant 0 : i32
    %c0_i32_0 = arith.constant 0 : i32
    return %c0_i32, %arg2 : i32, i32
  }
  func.func @transform_3(%arg0: i32, %arg1: i32, %arg2: i32) -> (i32, i32) {
    %c0_i32 = arith.constant 0 : i32
    %c0_i32_0 = arith.constant 0 : i32
    return %c0_i32, %arg2 : i32, i32
  }
  func.func @transform_4(%arg0: i32, %arg1: i32, %arg2: i32) -> (i32, i32) {
    %c0_i32 = arith.constant 0 : i32
    %c0_i32_0 = arith.constant 0 : i32
    return %arg2, %c0_i32 : i32, i32
  }
  func.func @transform_5(%arg0: i32, %arg1: i32, %arg2: i32) -> (i32, i32) {
    %c0_i32 = arith.constant 0 : i32
    %c0_i32_0 = arith.constant 0 : i32
    %c0_i32_1 = arith.constant 0 : i32
    return %c0_i32, %c0_i32_0 : i32, i32
  }
  func.func @transform_6(%arg0: i32, %arg1: i32, %arg2: i32) -> (i32, i32) {
    %c0_i32 = arith.constant 0 : i32
    %c0_i32_0 = arith.constant 0 : i32
    %c0_i32_1 = arith.constant 0 : i32
    return %c0_i32, %c0_i32_0 : i32, i32
  }
  func.func @transform_7(%arg0: i32, %arg1: i32, %arg2: i32) -> (i32, i32) {
    %c0_i32 = arith.constant 0 : i32
    %c0_i32_0 = arith.constant 0 : i32
    %c0_i32_1 = arith.constant 0 : i32
    return %c0_i32, %c0_i32_0 : i32, i32
  }
  func.func @transform_8(%arg0: i32, %arg1: i32, %arg2: i32) -> (i32, i32, i32) {
    %c0_i32 = arith.constant 0 : i32
    %c0_i32_0 = arith.constant 0 : i32
    return %arg0, %arg1, %c0_i32 : i32, i32, i32
  }
}

</mosaic_0001>

<bundles_post_ra>
// kernel: siglip_forward.14
= control target key start
LH: loop header
LB: loop body
LE: loop exit
PB: predicated region body
PF: predicated region fallthrough
CT: control target
= control target key end

     0   :  { %s588_s15 = smov 0   ;;  %s590_s16 = smov 0   ;;  %s643_s0 = inlined_call_operand.vmem [shape: f32[2,16,32], index: 0, kind: input, shape index: {}]   ;;  %s644_s1 = inlined_call_operand.vmem [shape: f32[2,16,32], index: 1, kind: input, shape index: {}]   ;;  %s645_s2 = inlined_call_operand.vmem [shape: f32[32,32], index: 2, kind: input, shape index: {}]   ;;  %s646_s3 = inlined_call_operand.vmem [shape: f32[1,32], index: 3, kind: input, shape index: {}]   ;;  %s647_s4 = inlined_call_operand.vmem [shape: f32[2,16,32], index: 4, kind: output, shape index: {}]  }
   0x1   :  { %s592_s17 = smov 0  }
   0x2 LB: > { %s26_s18 = sadd.s32 1, %s557_s16  ;;  %p483_p0 = scmp.ge.s32.totalorder %s561_s17, 1  ;;  %s561_s17 = sphi %s592_s17, %s14_s17   ;;  %s557_s16 = sphi %s590_s16, %s649_s16   ;;  %s553_s15 = sphi %s588_s15, %s648_s15  }
   0x3   : > { %p28_p1 = scmp.ge.s32.totalorder %s26_s18, 2  ;;  %p200_p2 = scmp.lt.s32.totalorder %s561_s17, 3 }
   0x5   : > { %s651_s18 = smov (%p28_p1, %s26_s18), 0  ;;  %p201_p3 = pnand %p483_p0, %p200_p2 }
   0x6   : > { %p244_p4 = scmp.lt.s32.totalorder (!%p201_p3), %s553_s15, 1 }
   0x7   : > { %204 = sbr.rel (%p201_p3) target bundleno = 221 (0xdd), region = 36 }
   0xc   : > { %v278_v0 = vld [vmem:[%s645_s2 + $0x18] sm:$0xff]  ;;  %v277_v1 = vld [vmem:[%s645_s2 + $0x10] sm:$0xff]  ;;  %v276_v2 = vld [vmem:[%s645_s2 + $0x8] sm:$0xff]  ;;  %s653_s15 = smov (!%p244_p4, %s553_s15), 1  ;;  %vm286_vm0 = vcmask 261120  }
   0xd   : > { %504 = vmatprep.subr.mxu0 %v278_v0  ;;  %v275_v3 = vld [vmem:[%s645_s2] sm:$0xff]  ;;  %s495_s27 = sshll.u32 %s653_s15, 4 }
   0xe   : > { %505 = vmatpush3.msra.mxu0 %v278_v0  ;;  %s251_s30 = scalar_lea.vmem %s643_s0, %s495_s27  ;;  %s261_s7 = scalar_lea.vmem %s644_s1, %s495_s27  ;;  %v490_v6 = vld [vmem:[%s646_s3] ss:$0 sm:$0xff] }
   0xf   : > { %506 = vmatprep.subr.mxu0 %v277_v1  ;;  %v273_v4 = vld [vmem:[%s251_s30] sm:$0xff]  ;;  %v274_v5 = vld [vmem:[%s251_s30 + $0x8] sm:$0xff]  ;;  %s271_s12 = scalar_lea.vmem %s647_s4, %s495_s27 }
  0x10   : > { %507 = vmatpush3.msra.mxu0 %v277_v1  ;;  %512 = vmatprep.mubr.msk.f32.mxu0 %vm286_vm0, %v273_v4  ;;  %v369_v8 = vld [vmem:[%s261_s7 + $0x8] sm:$0xff]  ;;  %v368_v11 = vld [vmem:[%s261_s7] sm:$0xff] }
  0x11   : > { %508 = vmatprep.subr.mxu0 %v276_v2 }
  0x12   : > { %509 = vmatpush3.msra.mxu0 %v276_v2 }
  0x13   : > { %510 = vmatprep.subr.mxu0 %v275_v3 }
  0x14   : > { %511 = vmatpush3.msra.mxu0 %v275_v3 }
  0x15   : > { %513 = vmatmul.mubr.msk.f32.vlgmr.msra.gmra.mxu0 %vm286_vm0, %v274_v5 }
  0xd5   : > { %v514_v7 = vpop.f32.mrf.mxu0 }
  0xd6   : > { %v365_v9 = vadd.f32 %v514_v7, %v490_v6 }
  0xd7   : > { %v359_v10 = vpop.f32.mrf.mxu0 }
  0xd8   : > { %v371_v12 = vadd.f32 %v369_v8, %v365_v9  ;;  %v360_v13 = vadd.f32 %v490_v6, %v359_v10 }
  0xda   : > { %373 = vst.msk [vmem:[%s271_s12 + $0x8] sm:$0xff] %vm286_vm0, %v371_v12  ;;  %v370_v14 = vadd.f32 %v368_v11, %v360_v13 }
  0xdc   : > { %372 = vst.msk [vmem:[%s271_s12] sm:$0xff] %vm286_vm0, %v370_v14 }
  0xdd PF: > { %s14_s17 = sadd.s32 1, %s561_s17   ;;  %s648_s15 = smov %s557_s16 }
  0xde   : > { %p11_p5 = scmp.ge.s32.totalorder %s14_s17, 4   ;;  %s649_s16 = smov %s651_s18 }
  0xe0   :  { %13 = sbr.rel (!%p11_p5) target bundleno = 2 (0x2), region = 69 }

// kernel: siglip_forward.13
= control target key start
LH: loop header
LB: loop body
LE: loop exit
PB: predicated region body
PF: predicated region fallthrough
CT: control target
= control target key end

     0   :  { %s769_s12 = smov 0   ;;  %s771_s13 = smov 0   ;;  %s846_s0 = inlined_call_operand.vmem [shape: f32[2,4,16,8], index: 0, kind: input, shape index: {}]   ;;  %s847_s1 = inlined_call_operand.vmem [shape: f32[2,4,16,8], index: 1, kind: input, shape index: {}]   ;;  %s848_s2 = inlined_call_operand.vmem [shape: f32[2,4,16,8], index: 2, kind: input, shape index: {}]   ;;  %s849_s3 = inlined_call_operand.vmem [shape: f32[2,4,16,8], index: 3, kind: output, shape index: {}]  }
   0x1   :  { %s773_s14 = smov 0   ;;  %s775_s15 = smov 0  }
   0x2   :  { %s777_s16 = smov 0  }
   0x3 LB: > { %s22_s17 = sadd.s32 1, %s739_s14  ;;  %s25_s18 = sadd.s32 1, %s743_s15  ;;  %s747_s16 = sphi %s777_s16, %s13_s16   ;;  %s743_s15 = sphi %s775_s15, %s853_s15   ;;  %s739_s14 = sphi %s773_s14, %s852_s14   ;;  %s735_s13 = sphi %s771_s13, %s851_s13   ;;  %s731_s12 = sphi %s769_s12, %s850_s12  }
   0x4   : > { %p23_p0 = scmp.ge.s32.totalorder %s22_s17, 4  ;;  %p618_p1 = scmp.ge.s32.totalorder %s747_s16, 1 }
   0x5   : > { %p189_p2 = scmp.lt.s32.totalorder %s747_s16, 9 }
   0x6   : > { %s855_s17 = smov (%p23_p0, %s22_s17), 0  ;;  %s857_s18 = smov (!%p23_p0, %s25_s18), %s743_s15 }
   0x7   : > { %p190_p3 = pnand %p618_p1, %p189_p2  ;;  %p27_p4 = scmp.ge.s32.totalorder %s857_s18, 2 }
   0x8   : > { %p239_p5 = scmp.lt.s32.totalorder (!%p190_p3), %s735_s13, 1  ;;  %p241_p6 = scmp.lt.s32.totalorder (!%p190_p3), %s731_s12, 3 }
   0x9   : > { %s859_s18 = smov (%p27_p4, %s857_s18), 0  ;;  %193 = sbr.rel (%p190_p3) target bundleno = 737 (0x2e1), region = 32 }
   0xe   : > { %s861_s13 = smov (!%p239_p5, %s735_s13), 1  ;;  %s863_s12 = smov (!%p241_p6, %s731_s12), 3  ;;  %vm281_vm0 = vcmask 64512   ;;  %vm371_vm1 = vcmask 130048  }
   0xf   : > { %s620_s19 = sshll.u32 %s861_s13, 3  ;;  %s619_s20 = sshll.u32 %s863_s12, 1 }
  0x10   : > { %s245_s21 = sadd.s32 %s620_s19, %s619_s20 }
  0x11   : > { %s799_s22 = sshll.u32 %s245_s21, 3 }
  0x12   : > { %s256_s25 = scalar_lea.vmem %s847_s1, %s799_s22  ;;  %s247_s28 = scalar_lea.vmem %s846_s0, %s799_s22 }
  0x13   : > { %v277_v0 = vld [vmem:[%s256_s25] sm:$0xff]  ;;  %v278_v1 = vld [vmem:[%s256_s25 + $0x8] sm:$0xff]  ;;  %s265_s4 = scalar_lea.vmem %s848_s2, %s799_s22  ;;  %s274_s7 = scalar_lea.vmem %s849_s3, %s799_s22 }
  0x14   : > { %v275_v2 = vld [vmem:[%s247_s28] sm:$0xff]  ;;  %647 = vmatprep.subr.msk.mxu0 %vm281_vm0, %v278_v1  ;;  %v276_v3 = vld [vmem:[%s247_s28 + $0x8] sm:$0xff] }
  0x15   : > { %651 = vmatprep.mubr.msk.f32.mxu0 %vm281_vm0, %v275_v2  ;;  %648 = vmatpush3.xpose.msk.msra.mxu0 %vm281_vm0, %v278_v1  ;;  %v280_v20 = vld [vmem:[%s265_s4 + $0x8] sm:$0xff]  ;;  %v279_v21 = vld [vmem:[%s265_s4] sm:$0xff] }
  0x16   : > { %649 = vmatprep.subr.msk.mxu0 %vm281_vm0, %v277_v0  ;;  %654 = vmatprep.subr.mxu1 %v280_v20 }
  0x17   : > { %655 = vmatpush3.msra.mxu1 %v280_v20 }
  0x18   : > { %656 = vmatprep.subr.mxu1 %v279_v21 }
  0x19   : > { %650 = vmatpush3.xpose.msk.msra.mxu0 %vm281_vm0, %v277_v0  ;;  %657 = vmatpush3.msra.mxu1 %v279_v21 }
  0x1c   : > { %652 = vmatmul.mubr.msk.f32.vlgmr.msra.gmra.mxu0 %vm281_vm0, %v276_v3 }
  0xdc   : > { %v653_v4 = vpop.f32.mrf.mxu0 }
  0xdd   : > { %v370_v7 = vmul.f32 0.35355338, %v653_v4 }
  0xde   : > { %v360_v5 = vpop.f32.mrf.mxu0 }
  0xdf   : > { %v369_v6 = vmul.f32 0.35355338, %v360_v5  ;;  %v375_v9 = vsel %vm371_vm1, %v370_v7, -inf }
  0xe1   : > { %v372_v8 = vsel %vm371_vm1, %v369_v6, -inf }
  0xe2   : > { %373 = vmax.xlane.f32.xlu0 %v372_v8 }
  0xe6   : > { %376 = vmax.xlane.f32.xlu0 %v375_v9 }
 0x16b   : > { %v374_v10 = vpop.xlane.xlu0 %373 }
 0x16c   : > { %v378_v11 = vsub.f32 %v369_v6, %v374_v10 }
 0x16e   : > { %v380_v12 = vmul.f32 1.442695, %v378_v11 }
 0x16f   : > { %v377_v13 = vpop.xlane.xlu0 %376 }
 0x170   : > { %701 = vpow2.f32 %v380_v12  ;;  %v379_v14 = vsub.f32 %v370_v7, %v377_v13 }
 0x172   : > { %v382_v15 = vmul.f32 1.442695, %v379_v14 }
 0x174   : > { %703 = vpow2.f32 %v382_v15 }
 0x17d   : > { %v702_v16 = vpop.eup %701 }
 0x17e   : > { %v384_v17 = vsel %vm371_vm1, %v702_v16, 0.0 }
 0x17f   : > { %385 = vadd.xlane.f32.xlu1 %v384_v17 }
 0x181   : > { %v704_v18 = vpop.eup %703 }
 0x182   : > { %v387_v19 = vsel %vm371_vm1, %v704_v18, 0.0 }
 0x183   : > { %388 = vadd.xlane.f32.xlu1 %v387_v19 }
 0x208   : > { %v386_v22 = vpop.xlane.xlu1 %385 }
 0x209   : > { %705 = vrcp.f32 %v386_v22 }
 0x20c   : > { %v389_v23 = vpop.xlane.xlu1 %388 }
 0x20d   : > { %707 = vrcp.f32 %v389_v23 }
 0x216   : > { %v706_v24 = vpop.eup %705 }
 0x217   : > { %v392_v25 = vmul.f32 %v706_v24, %v702_v16 }
 0x219   : > { %658 = vmatprep.mubr.msk.f32.mxu1 %vm371_vm1, %v392_v25 }
 0x21a   : > { %v708_v26 = vpop.eup %707 }
 0x21b   : > { %v393_v27 = vmul.f32 %v708_v26, %v704_v18 }
 0x21d   : > { %659 = vmatmul.mubr.msk.f32.vlgmr.msra.gmra.mxu1 %vm371_vm1, %v393_v27 }
 0x2dd   : > { %v660_v28 = vpop.f32.mrf.mxu1 }
 0x2de   : > { %476 = vst.msk [vmem:[%s274_s7 + $0x8] sm:$0xff] %vm281_vm0, %v660_v28 }
 0x2df   : > { %v466_v29 = vpop.f32.mrf.mxu1 }
 0x2e0   : > { %475 = vst.msk [vmem:[%s274_s7] sm:$0xff] %vm281_vm0, %v466_v29 }
 0x2e1 PF: > { %s13_s16 = sadd.s32 1, %s747_s16   ;;  %s850_s12 = smov %s739_s14 }
 0x2e2   : > { %p10_p7 = scmp.ge.s32.totalorder %s13_s16, 10   ;;  %s851_s13 = smov %s743_s15 }
 0x2e3   : > { %s852_s14 = smov %s855_s17  ;;  %s853_s15 = smov %s859_s18 }
 0x2e4   :  { %12 = sbr.rel (!%p10_p7) target bundleno = 3 (0x3), region = 68 }

// kernel: siglip_forward.12
= control target key start
LH: loop header
LB: loop body
LE: loop exit
PB: predicated region body
PF: predicated region fallthrough
CT: control target
= control target key end

     0   :  { %s611_s18 = smov 0   ;;  %s613_s19 = smov 0   ;;  %s678_s0 = inlined_call_operand.vmem [shape: f32[2,16,32], index: 0, kind: input, shape index: {}]   ;;  %s679_s1 = inlined_call_operand.vmem [shape: f32[32,96], index: 1, kind: input, shape index: {}]   ;;  %s680_s2 = inlined_call_operand.vmem [shape: f32[1,96], index: 2, kind: input, shape index: {}]   ;;  %s681_s3 = inlined_call_operand.vmem [shape: f32[1,32], index: 3, kind: input, shape index: {}]   ;;  %s682_s4 = inlined_call_operand.vmem [shape: f32[1,32], index: 4, kind: input, shape index: {}]   ;;  %s683_s5 = inlined_call_operand.vmem [shape: f32[2,16,96], index: 5, kind: output, shape index: {}]  }
   0x1   :  { %s615_s20 = smov 0  }
   0x2 LB: > { %s27_s21 = sadd.s32 1, %s575_s19  ;;  %p498_p0 = scmp.ge.s32.totalorder %s579_s20, 1  ;;  %s579_s20 = sphi %s615_s20, %s15_s20   ;;  %s575_s19 = sphi %s613_s19, %s685_s19   ;;  %s571_s18 = sphi %s611_s18, %s684_s18  }
   0x3   : > { %p29_p1 = scmp.ge.s32.totalorder %s27_s21, 2  ;;  %p208_p2 = scmp.lt.s32.totalorder %s579_s20, 3 }
   0x5   : > { %s687_s21 = smov (%p29_p1, %s27_s21), 0  ;;  %p209_p3 = pnand %p498_p0, %p208_p2 }
   0x6   : > { %p245_p4 = scmp.lt.s32.totalorder (!%p209_p3), %s571_s18, 1 }
   0x7   : > { %212 = sbr.rel (%p209_p3) target bundleno = 526 (0x20e), region = 40 }
   0xc   : > { %s689_s18 = smov (!%p245_p4, %s571_s18), 1  ;;  %vm268_vm0 = vcmask 261120   ;;  %v315_v14 = vld [vmem:[%s679_s1 + $0x18] sm:$0xff]  ;;  %v314_v15 = vld [vmem:[%s679_s1 + $0x10] sm:$0xff]  ;;  %v313_v16 = vld [vmem:[%s679_s1 + $0x8] sm:$0xff]  ;;  %vm404_vm1 = vcmask 785408  }
   0xd   : > { %s510_s22 = sshll.u32 %s689_s18, 4  ;;  %518 = vmatprep.subr.mxu0 %v315_v14  ;;  %v312_v17 = vld [vmem:[%s679_s1] sm:$0xff] }
   0xe   : > { %s252_s25 = scalar_lea.vmem %s678_s0, %s510_s22  ;;  %519 = vmatpush3.msra.mxu0 %v315_v14  ;;  %v503_v25 = vld [vmem:[%s681_s3] ss:$0 sm:$0xff]  ;;  %s262_s17 = scalar_lea.vmem %s683_s5, %s510_s22 }
   0xf   : > { %v264_v0 = vld [vmem:[%s252_s25] sm:$0xff]  ;;  %v265_v1 = vld [vmem:[%s252_s25 + $0x8] sm:$0xff]  ;;  %520 = vmatprep.subr.mxu0 %v314_v15 }
  0x10   : > { %v269_v2 = vsel %vm268_vm0, %v264_v0, 0.0  ;;  %v272_v3 = vsel %vm268_vm0, %v265_v1, 0.0  ;;  %521 = vmatpush3.msra.mxu0 %v314_v15  ;;  %v504_v27 = vld [vmem:[%s682_s4] ss:$0 sm:$0xff] }
  0x11   : > { %270 = vadd.xlane.f32.xlu0 %v269_v2  ;;  %522 = vmatprep.subr.mxu0 %v313_v16  ;;  %v505_v34 = vld [vmem:[%s680_s2] ss:$0 sm:$0xff] }
  0x12   : > { %523 = vmatpush3.msra.mxu0 %v313_v16 }
  0x13   : > { %524 = vmatprep.subr.mxu0 %v312_v17 }
  0x14   : > { %525 = vmatpush3.msra.mxu0 %v312_v17 }
  0x15   : > { %273 = vadd.xlane.f32.xlu0 %v272_v3 }
  0x9a   : > { %v271_v4 = vpop.xlane.xlu0 %270 }
  0x9b   : > { %v276_v5 = vmul.f32 0.03125, %v271_v4 }
  0x9d   : > { %v278_v6 = vsub.f32 %v264_v0, %v276_v5 }
  0x9e   : > { %v274_v7 = vpop.xlane.xlu0 %273 }
  0x9f   : > { %v277_v8 = vmul.f32 0.03125, %v274_v7  ;;  %v280_v9 = vmul.f32 %v278_v6, %v278_v6 }
  0xa1   : > { %v279_v10 = vsub.f32 %v265_v1, %v277_v8  ;;  %v282_v11 = vsel %vm268_vm0, %v280_v9, 0.0 }
  0xa2   : > { %283 = vadd.xlane.f32.xlu1 %v282_v11 }
  0xa3   : > { %v281_v12 = vmul.f32 %v279_v10, %v279_v10 }
  0xa5   : > { %v285_v13 = vsel %vm268_vm0, %v281_v12, 0.0 }
  0xa6   : > { %286 = vadd.xlane.f32.xlu1 %v285_v13 }
 0x12b   : > { %v284_v18 = vpop.xlane.xlu1 %283 }
 0x12c   : > { %v288_v19 = vmul.f32 0.03125, %v284_v18 }
 0x12e   : > { %v290_v20 = vadd.f32 1e-06, %v288_v19 }
 0x12f   : > { %v287_v21 = vpop.xlane.xlu1 %286 }
 0x130   : > { %553 = vrsqrt.f32 %v290_v20  ;;  %v289_v22 = vmul.f32 0.03125, %v287_v21 }
 0x132   : > { %v291_v23 = vadd.f32 1e-06, %v289_v22 }
 0x134   : > { %555 = vrsqrt.f32 %v291_v23 }
 0x13d   : > { %v554_v24 = vpop.eup %553 }
 0x13e   : > { %v294_v26 = vmul.f32 %v554_v24, %v278_v6 }
 0x140   : > { %v302_v28 = vmul.f32 %v503_v25, %v294_v26 }
 0x141   : > { %v556_v29 = vpop.eup %555 }
 0x142   : > { %v295_v30 = vmul.f32 %v556_v29, %v279_v10  ;;  %v310_v31 = vadd.f32 %v504_v27, %v302_v28 }
 0x144   : > { %v303_v32 = vmul.f32 %v503_v25, %v295_v30  ;;  %526 = vmatprep.mubr.msk.f32.mxu0 %vm268_vm0, %v310_v31 }
 0x146   : > { %v311_v33 = vadd.f32 %v504_v27, %v303_v32 }
 0x148   : > { %527 = vmatmul.mubr.msk.f32.vlgmr.msra.gmra.mxu0 %vm268_vm0, %v311_v33 }
 0x208   : > { %v528_v35 = vpop.f32.mrf.mxu0 }
 0x209   : > { %v401_v36 = vadd.f32 %v528_v35, %v505_v34 }
 0x20a   : > { %v395_v37 = vpop.f32.mrf.mxu0 }
 0x20b   : > { %406 = vst.msk [vmem:[%s262_s17 + $0x8] sm:$0xff] %vm404_vm1, %v401_v36  ;;  %v396_v38 = vadd.f32 %v505_v34, %v395_v37 }
 0x20d   : > { %405 = vst.msk [vmem:[%s262_s17] sm:$0xff] %vm404_vm1, %v396_v38 }
 0x20e PF: > { %s15_s20 = sadd.s32 1, %s579_s20   ;;  %s684_s18 = smov %s575_s19 }
 0x20f   : > { %p12_p5 = scmp.ge.s32.totalorder %s15_s20, 4   ;;  %s685_s19 = smov %s687_s21 }
 0x211   :  { %14 = sbr.rel (!%p12_p5) target bundleno = 2 (0x2), region = 70 }

// kernel: siglip_forward.11
= control target key start
LH: loop header
LB: loop body
LE: loop exit
PB: predicated region body
PF: predicated region fallthrough
CT: control target
= control target key end

     0   :  { %s631_s15 = smov 0   ;;  %s633_s16 = smov 0   ;;  %s801_s0 = inlined_call_operand.vmem [shape: f32[2,16,192], index: 0, kind: input, shape index: {}]   ;;  %s802_s1 = inlined_call_operand.vmem [shape: f32[192,32], index: 1, kind: input, shape index: {}]   ;;  %s803_s2 = inlined_call_operand.vmem [shape: f32[1,32], index: 2, kind: input, shape index: {}]   ;;  %s804_s3 = inlined_call_operand.vmem [shape: f32[16,32], index: 3, kind: input, shape index: {}]   ;;  %s805_s4 = inlined_call_operand.vmem [shape: f32[2,16,32], index: 4, kind: output, shape index: {}]  }
   0x1   :  { %s635_s17 = smov 0  }
   0x2 LB: > { %s26_s18 = sadd.s32 1, %s599_s16  ;;  %p496_p0 = scmp.ge.s32.totalorder %s603_s17, 1  ;;  %s603_s17 = sphi %s635_s17, %s14_s17   ;;  %s599_s16 = sphi %s633_s16, %s807_s16   ;;  %s595_s15 = sphi %s631_s15, %s806_s15  }
   0x3   : > { %p28_p1 = scmp.ge.s32.totalorder %s26_s18, 2  ;;  %p195_p2 = scmp.lt.s32.totalorder %s603_s17, 3 }
   0x5   : > { %s809_s18 = smov (%p28_p1, %s26_s18), 0  ;;  %p196_p3 = pnand %p496_p0, %p195_p2 }
   0x6   : > { %p236_p4 = scmp.lt.s32.totalorder (!%p196_p3), %s595_s15, 1 }
   0x7   : > { %199 = sbr.rel (%p196_p3) target bundleno = 260 (0x104), region = 36 }
   0xc   : > { %v281_v0 = vld [vmem:[%s802_s1 + $0x78] sm:$0xff]  ;;  %v605_v1 = vmov 0.0   ;;  %v280_v2 = vld [vmem:[%s802_s1 + $0x70] sm:$0xff]  ;;  %v279_v3 = vld [vmem:[%s802_s1 + $0x68] sm:$0xff]  ;;  %s811_s15 = smov (!%p236_p4, %s595_s15), 1  ;;  %vm297_vm0 = vcmask 523264  }
   0xd   : > { %304 = vmatprep.subr.mxu0 %v605_v1  ;;  %508 = vmatprep.subr.mxu1 %v605_v1  ;;  %v278_v4 = vld [vmem:[%s802_s1 + $0x60] sm:$0xff]  ;;  %v277_v5 = vld [vmem:[%s802_s1 + $0x58] sm:$0xff]  ;;  %v276_v6 = vld [vmem:[%s802_s1 + $0x50] sm:$0xff]  ;;  %s506_s13 = sshll.u32 %s811_s15, 5  ;;  %s507_s29 = sshll.u32 %s811_s15, 4  ;;  %vm383_vm1 = vcmask 261120  }
   0xe   : > { %305 = vmatpush1.msra.mxu0 %v281_v0  ;;  %532 = vmatpush1.msra.mxu1 %v281_v0  ;;  %v275_v7 = vld [vmem:[%s802_s1 + $0x48] sm:$0xff]  ;;  %v274_v8 = vld [vmem:[%s802_s1 + $0x40] sm:$0xff]  ;;  %v273_v9 = vld [vmem:[%s802_s1 + $0x38] sm:$0xff]  ;;  %s244_s24 = scalar_lea.vmem %s801_s0, %s506_s13  ;;  %s260_s10 = scalar_lea.vmem %s805_s4, %s507_s29 }
   0xf   : > { %306 = vmatprep.subr.mxu0 %v605_v1  ;;  %509 = vmatprep.subr.mxu1 %v605_v1  ;;  %v272_v10 = vld [vmem:[%s802_s1 + $0x30] sm:$0xff]  ;;  %v271_v11 = vld [vmem:[%s802_s1 + $0x28] sm:$0xff]  ;;  %v270_v12 = vld [vmem:[%s802_s1 + $0x20] sm:$0xff] }
  0x10   : > { %307 = vmatpush1.msra.mxu0 %v280_v2  ;;  %533 = vmatpush1.msra.mxu1 %v280_v2  ;;  %v269_v13 = vld [vmem:[%s802_s1 + $0x18] sm:$0xff]  ;;  %v268_v14 = vld [vmem:[%s802_s1 + $0x10] sm:$0xff]  ;;  %v267_v15 = vld [vmem:[%s802_s1 + $0x8] sm:$0xff] }
  0x11   : > { %308 = vmatprep.subr.mxu0 %v605_v1  ;;  %510 = vmatprep.subr.mxu1 %v605_v1  ;;  %v266_v16 = vld [vmem:[%s802_s1] sm:$0xff]  ;;  %v289_v17 = vld [vmem:[%s802_s1 + $0xb8] sm:$0xff]  ;;  %v288_v18 = vld [vmem:[%s802_s1 + $0xb0] sm:$0xff] }
  0x12   : > { %309 = vmatpush1.msra.mxu0 %v279_v3  ;;  %534 = vmatpush1.msra.mxu1 %v279_v3  ;;  %v287_v19 = vld [vmem:[%s802_s1 + $0xa8] sm:$0xff]  ;;  %v286_v20 = vld [vmem:[%s802_s1 + $0xa0] sm:$0xff]  ;;  %v285_v21 = vld [vmem:[%s802_s1 + $0x98] sm:$0xff] }
  0x13   : > { %310 = vmatprep.subr.mxu0 %v605_v1  ;;  %511 = vmatprep.subr.mxu1 %v605_v1  ;;  %v284_v22 = vld [vmem:[%s802_s1 + $0x90] sm:$0xff]  ;;  %v283_v23 = vld [vmem:[%s802_s1 + $0x88] sm:$0xff]  ;;  %v282_v24 = vld [vmem:[%s802_s1 + $0x80] sm:$0xff] }
  0x14   : > { %311 = vmatpush1.msra.mxu0 %v278_v4  ;;  %535 = vmatpush1.msra.mxu1 %v278_v4  ;;  %v263_v25 = vld [vmem:[%s244_s24 + $0x8] sm:$0xff]  ;;  %v265_v26 = vld [vmem:[%s244_s24 + $0x18] sm:$0xff]  ;;  %v262_v27 = vld [vmem:[%s244_s24] sm:$0xff] }
  0x15   : > { %312 = vmatprep.subr.mxu0 %v605_v1  ;;  %512 = vmatprep.subr.mxu1 %v605_v1  ;;  %v264_v28 = vld [vmem:[%s244_s24 + $0x10] sm:$0xff]  ;;  %v501_v29 = vld [vmem:[%s803_s2] ss:$0 sm:$0xff]  ;;  %v380_v33 = vld [vmem:[%s804_s3 + $0x8] sm:$0xff] }
  0x16   : > { %313 = vmatpush1.msra.mxu0 %v277_v5  ;;  %536 = vmatpush1.msra.mxu1 %v277_v5  ;;  %v379_v31 = vld [vmem:[%s804_s3] sm:$0xff] }
  0x17   : > { %314 = vmatprep.subr.mxu0 %v605_v1  ;;  %513 = vmatprep.subr.mxu1 %v605_v1 }
  0x18   : > { %315 = vmatpush1.msra.mxu0 %v276_v6  ;;  %537 = vmatpush1.msra.mxu1 %v276_v6 }
  0x19   : > { %316 = vmatprep.subr.mxu0 %v605_v1  ;;  %514 = vmatprep.subr.mxu1 %v605_v1 }
  0x1a   : > { %317 = vmatpush1.msra.mxu0 %v275_v7  ;;  %538 = vmatpush1.msra.mxu1 %v275_v7 }
  0x1b   : > { %318 = vmatprep.subr.mxu0 %v605_v1  ;;  %515 = vmatprep.subr.mxu1 %v605_v1 }
  0x1c   : > { %319 = vmatpush1.msra.mxu0 %v274_v8  ;;  %539 = vmatpush1.msra.mxu1 %v274_v8 }
  0x1d   : > { %320 = vmatprep.subr.mxu0 %v605_v1  ;;  %516 = vmatprep.subr.mxu1 %v605_v1 }
  0x1e   : > { %321 = vmatpush1.msra.mxu0 %v273_v9  ;;  %540 = vmatpush1.msra.mxu1 %v273_v9 }
  0x1f   : > { %322 = vmatprep.subr.mxu0 %v605_v1  ;;  %517 = vmatprep.subr.mxu1 %v605_v1 }
  0x20   : > { %323 = vmatpush1.msra.mxu0 %v272_v10  ;;  %541 = vmatpush1.msra.mxu1 %v272_v10 }
  0x21   : > { %324 = vmatprep.subr.mxu0 %v605_v1  ;;  %518 = vmatprep.subr.mxu1 %v605_v1 }
  0x22   : > { %325 = vmatpush1.msra.mxu0 %v271_v11  ;;  %542 = vmatpush1.msra.mxu1 %v271_v11 }
  0x23   : > { %326 = vmatprep.subr.mxu0 %v605_v1  ;;  %519 = vmatprep.subr.mxu1 %v605_v1 }
  0x24   : > { %327 = vmatpush1.msra.mxu0 %v270_v12  ;;  %543 = vmatpush1.msra.mxu1 %v270_v12 }
  0x25   : > { %328 = vmatprep.subr.mxu0 %v605_v1  ;;  %520 = vmatprep.subr.mxu1 %v605_v1 }
  0x26   : > { %329 = vmatpush1.msra.mxu0 %v269_v13  ;;  %544 = vmatpush1.msra.mxu1 %v269_v13 }
  0x27   : > { %330 = vmatprep.subr.mxu0 %v605_v1  ;;  %521 = vmatprep.subr.mxu1 %v605_v1 }
  0x28   : > { %331 = vmatpush1.msra.mxu0 %v268_v14  ;;  %545 = vmatpush1.msra.mxu1 %v268_v14 }
  0x29   : > { %332 = vmatprep.subr.mxu0 %v605_v1  ;;  %522 = vmatprep.subr.mxu1 %v605_v1 }
  0x2a   : > { %333 = vmatpush1.msra.mxu0 %v267_v15  ;;  %546 = vmatpush1.msra.mxu1 %v267_v15 }
  0x2b   : > { %334 = vmatprep.subr.mxu0 %v605_v1  ;;  %523 = vmatprep.subr.mxu1 %v605_v1 }
  0x2c   : > { %335 = vmatpush1.msra.mxu0 %v266_v16  ;;  %547 = vmatpush1.msra.mxu1 %v266_v16 }
  0x2d   : > { %352 = vmatprep.subr.mxu0 %v605_v1  ;;  %524 = vmatprep.subr.mxu1 %v605_v1 }
  0x2e   : > { %353 = vmatpush2.msra.mxu0 %v289_v17  ;;  %548 = vmatpush2.msra.mxu1 %v289_v17 }
  0x2f   : > { %354 = vmatprep.subr.mxu0 %v605_v1  ;;  %525 = vmatprep.subr.mxu1 %v605_v1 }
  0x30   : > { %355 = vmatpush2.msra.mxu0 %v288_v18  ;;  %549 = vmatpush2.msra.mxu1 %v288_v18 }
  0x31   : > { %356 = vmatprep.subr.mxu0 %v605_v1  ;;  %526 = vmatprep.subr.mxu1 %v605_v1 }
  0x32   : > { %357 = vmatpush2.msra.mxu0 %v287_v19  ;;  %550 = vmatpush2.msra.mxu1 %v287_v19 }
  0x33   : > { %358 = vmatprep.subr.mxu0 %v605_v1  ;;  %527 = vmatprep.subr.mxu1 %v605_v1 }
  0x34   : > { %359 = vmatpush2.msra.mxu0 %v286_v20  ;;  %551 = vmatpush2.msra.mxu1 %v286_v20 }
  0x35   : > { %360 = vmatprep.subr.mxu0 %v605_v1  ;;  %528 = vmatprep.subr.mxu1 %v605_v1 }
  0x36   : > { %361 = vmatpush2.msra.mxu0 %v285_v21  ;;  %552 = vmatpush2.msra.mxu1 %v285_v21 }
  0x37   : > { %362 = vmatprep.subr.mxu0 %v605_v1  ;;  %529 = vmatprep.subr.mxu1 %v605_v1 }
  0x38   : > { %363 = vmatpush2.msra.mxu0 %v284_v22  ;;  %553 = vmatpush2.msra.mxu1 %v284_v22 }
  0x39   : > { %364 = vmatprep.subr.mxu0 %v605_v1  ;;  %530 = vmatprep.subr.mxu1 %v605_v1 }
  0x3a   : > { %365 = vmatpush2.msra.mxu0 %v283_v23  ;;  %554 = vmatpush2.msra.mxu1 %v283_v23 }
  0x3b   : > { %366 = vmatprep.subr.mxu0 %v605_v1  ;;  %531 = vmatprep.subr.mxu1 %v605_v1 }
  0x3c   : > { %367 = vmatpush2.msra.mxu0 %v282_v24  ;;  %555 = vmatpush2.msra.mxu1 %v282_v24 }
  0x3d   : > { %502 = vmatprep.mubr.msk.f32.mxu0 %vm297_vm0, %v263_v25  ;;  %503 = vmatprep.mubr.msk.f32.mxu1 %vm297_vm0, %v265_v26 }
  0x3e   : > { %369 = vmatmul.mubr.f32.vlgmr.msra.gmra.mxu0 %v262_v27  ;;  %374 = vmatmul.mubr.f32.vlgmr.msra.gmra.mxu1 %v264_v28 }
  0xfe   : > { %v370_v30 = vpop.f32.mrf.mxu0  ;;  %v375_v32 = vpop.f32.mrf.mxu1 }
  0xff   : > { %v371_v34 = vadd.f32 %v501_v29, %v370_v30  ;;  %v376_v35 = vadd.f32 %v501_v29, %v375_v32 }
 0x100   : > { %v372_v36 = vpop.f32.mrf.mxu0  ;;  %v377_v37 = vpop.f32.mrf.mxu1 }
 0x101   : > { %v381_v38 = vadd.f32 %v379_v31, %v371_v34  ;;  %v382_v39 = vadd.f32 %v380_v33, %v376_v35 }
 0x103   : > { %384 = vst.msk [vmem:[%s260_s10] sm:$0xff] %vm383_vm1, %v381_v38  ;;  %385 = vst.msk [vmem:[%s260_s10 + $0x8] sm:$0xff] %vm383_vm1, %v382_v39 }
 0x104 PF: > { %s14_s17 = sadd.s32 1, %s603_s17   ;;  %s806_s15 = smov %s599_s16 }
 0x105   : > { %p11_p5 = scmp.ge.s32.totalorder %s14_s17, 4   ;;  %s807_s16 = smov %s809_s18 }
 0x107   :  { %13 = sbr.rel (!%p11_p5) target bundleno = 2 (0x2), region = 69 }

// kernel: siglip_forward.16
= control target key start
LH: loop header
LB: loop body
LE: loop exit
PB: predicated region body
PF: predicated region fallthrough
CT: control target
= control target key end

     0   :  { %s997_s27 = smov 0   ;;  %s999_s28 = smov 0   ;;  %s1088_s0 = inlined_call_operand.vmem [shape: f32[2,16,32], index: 0, kind: input, shape index: {}]   ;;  %s1089_s1 = inlined_call_operand.vmem [shape: f32[2,16,32], index: 1, kind: input, shape index: {}]   ;;  %s1090_s2 = inlined_call_operand.vmem [shape: f32[32,64], index: 2, kind: input, shape index: {}]   ;;  %s1091_s3 = inlined_call_operand.vmem [shape: f32[1,64], index: 3, kind: input, shape index: {}]   ;;  %s1092_s4 = inlined_call_operand.vmem [shape: f32[64,32], index: 4, kind: input, shape index: {}]   ;;  %s1093_s5 = inlined_call_operand.vmem [shape: f32[1,32], index: 5, kind: input, shape index: {}]   ;;  %s1094_s6 = inlined_call_operand.vmem [shape: f32[1,32], index: 6, kind: input, shape index: {}]   ;;  %s1095_s7 = inlined_call_operand.vmem [shape: f32[1,32], index: 7, kind: input, shape index: {}]   ;;  %s1096_s8 = inlined_call_operand.vmem [shape: f32[2,16,32], index: 8, kind: output, shape index: {}]  }
   0x1   :  { %s1001_s29 = smov 0  }
   0x2 LB: > { %s37_s6 = sadd.s32 1, %s945_s28  ;;  %p834_p0 = scmp.ge.s32.totalorder %s949_s29, 1  ;;  %s949_s29 = sphi %s1001_s29, %s18_s29   ;;  %s945_s28 = sphi %s999_s28, %s1098_s28   ;;  %s941_s27 = sphi %s997_s27, %s1097_s27  }
   0x3   : > { %p39_p1 = scmp.ge.s32.totalorder %s37_s6, 2  ;;  %p335_p2 = scmp.lt.s32.totalorder %s949_s29, 3 }
   0x5   : > { %s1100_s6 = smov (%p39_p1, %s37_s6), 0  ;;  %p336_p3 = pnand %p834_p0, %p335_p2 }
   0x6   : > { %p399_p4 = scmp.lt.s32.totalorder (!%p336_p3), %s941_s27, 1 }
   0x7   : > { %339 = sbr.rel (%p336_p3) target bundleno = 457 (0x1c9), region = 52 }
   0xc   : > { %v453_v0 = vld [vmem:[%s1090_s2 + $0x18] sm:$0xff]  ;;  %v452_v1 = vld [vmem:[%s1090_s2 + $0x10] sm:$0xff]  ;;  %v451_v2 = vld [vmem:[%s1090_s2 + $0x8] sm:$0xff]  ;;  %s1102_s27 = smov (!%p399_p4, %s941_s27), 1  ;;  %vm445_vm0 = vcmask 261120   ;;  %v951_v14 = vmov 0.0  }
   0xd   : > { %868 = vmatprep.subr.mxu0 %v453_v0  ;;  %v450_v3 = vld [vmem:[%s1090_s2] sm:$0xff]  ;;  %s1027_s15 = sshll.u32 %s1102_s27, 4  ;;  %v570_v6 = vld [vmem:[%s1092_s4 + $0x38] sm:$0xff]  ;;  %v569_v7 = vld [vmem:[%s1092_s4 + $0x30] sm:$0xff]  ;;  %447 = vst.msk [vmem:[#allocation2 + $0x8] sm:$0xff] %vm445_vm0, %v951_v14  ;;  %vm571_vm1 = vcmask 523264  }
   0xe   : > { %869 = vmatpush3.msra.mxu0 %v453_v0  ;;  %s406_s18 = scalar_lea.vmem %s1088_s0, %s1027_s15  ;;  %879 = vmatprep.subr.mxu1 %v570_v6  ;;  %v568_v8 = vld [vmem:[%s1092_s4 + $0x28] sm:$0xff]  ;;  %v567_v9 = vld [vmem:[%s1092_s4 + $0x20] sm:$0xff]  ;;  %v566_v10 = vld [vmem:[%s1092_s4 + $0x18] sm:$0xff]  ;;  %446 = vst.msk [vmem:[#allocation2] sm:$0xff] %vm445_vm0, %v951_v14  ;;  %s416_s19 = scalar_lea.vmem %s1089_s1, %s1027_s15 }
   0xf   : > { %870 = vmatprep.subr.mxu0 %v452_v1  ;;  %v448_v4 = vld [vmem:[%s406_s18] sm:$0xff]  ;;  %v449_v5 = vld [vmem:[%s406_s18 + $0x8] sm:$0xff]  ;;  %880 = vmatpush3.msra.mxu1 %v570_v6  ;;  %v565_v11 = vld [vmem:[%s1092_s4 + $0x10] sm:$0xff]  ;;  %s439_s24 = scalar_lea.vmem %s1096_s8, %s1027_s15 }
  0x10   : > { %871 = vmatpush3.msra.mxu0 %v452_v1  ;;  %876 = vmatprep.mubr.msk.f32.mxu0 %vm445_vm0, %v448_v4  ;;  %v564_v12 = vld [vmem:[%s1092_s4 + $0x8] sm:$0xff]  ;;  %v563_v13 = vld [vmem:[%s1092_s4] sm:$0xff] }
  0x11   : > { %872 = vmatprep.subr.mxu0 %v451_v2  ;;  %881 = vmatprep.subr.mxu1 %v569_v7  ;;  %v841_v15 = vld [vmem:[%s1091_s3] ss:$0 sm:$0xff]  ;;  %v661_v44 = vld [vmem:[%s416_s19 + $0x8] sm:$0xff] }
  0x12   : > { %873 = vmatpush3.msra.mxu0 %v451_v2  ;;  %882 = vmatpush3.msra.mxu1 %v569_v7  ;;  %v660_v45 = vld [vmem:[%s416_s19] sm:$0xff] }
  0x13   : > { %874 = vmatprep.subr.mxu0 %v450_v3  ;;  %883 = vmatprep.subr.mxu1 %v568_v8  ;;  %v846_v47 = vld [vmem:[%s1093_s5] ss:$0 sm:$0xff] }
  0x14   : > { %875 = vmatpush3.msra.mxu0 %v450_v3  ;;  %884 = vmatpush3.msra.mxu1 %v568_v8  ;;  %v562_v38 = vld [vmem:[#allocation2 + $0x8] sm:$0xff] }
  0x15   : > { %877 = vmatmul.mubr.msk.f32.vlgmr.msra.gmra.mxu0 %vm445_vm0, %v449_v5  ;;  %885 = vmatprep.subr.mxu1 %v567_v9  ;;  %v561_v40 = vld [vmem:[#allocation2] sm:$0xff] }
  0x16   : > { %886 = vmatpush3.msra.mxu1 %v567_v9 }
  0x17   : > { %887 = vmatprep.subr.mxu1 %v566_v10 }
  0x18   : > { %888 = vmatpush3.msra.mxu1 %v566_v10 }
  0x19   : > { %889 = vmatprep.subr.mxu1 %v565_v11 }
  0x1a   : > { %890 = vmatpush3.msra.mxu1 %v565_v11 }
  0x1b   : > { %891 = vmatprep.subr.mxu1 %v564_v12 }
  0x1c   : > { %892 = vmatpush3.msra.mxu1 %v564_v12 }
  0x1d   : > { %893 = vmatprep.subr.mxu1 %v563_v13 }
  0x1e   : > { %894 = vmatpush3.msra.mxu1 %v563_v13 }
  0xd5   : > { %v878_v16 = vpop.f32.mrf.mxu0 }
  0xd6   : > { %v540_v17 = vadd.f32 %v878_v16, %v841_v15 }
  0xd7   : > { %v534_v18 = vpop.f32.mrf.mxu0 }
  0xd8   : > { %v546_v19 = vmul.f32 0.044715, %v540_v17  ;;  %v535_v20 = vadd.f32 %v841_v15, %v534_v18  ;;  %v544_v35 = vmul.f32 0.5, %v540_v17 }
  0xda   : > { %v548_v21 = vmul.f32 %v546_v19, %v540_v17  ;;  %v545_v22 = vmul.f32 0.044715, %v535_v20  ;;  %v543_v33 = vmul.f32 0.5, %v535_v20 }
  0xdc   : > { %v550_v23 = vmul.f32 %v548_v21, %v540_v17  ;;  %v547_v24 = vmul.f32 %v545_v22, %v535_v20 }
  0xde   : > { %v552_v25 = vadd.f32 %v550_v23, %v540_v17  ;;  %v549_v26 = vmul.f32 %v547_v24, %v535_v20 }
  0xe0   : > { %v551_v27 = vadd.f32 %v549_v26, %v535_v20  ;;  %v554_v28 = vmul.f32 0.7978846, %v552_v25 }
  0xe2   : > { %v553_v29 = vmul.f32 0.7978846, %v551_v27  ;;  %923 = vtanh.f32 %v554_v28 }
  0xe4   : > { %925 = vtanh.f32 %v553_v29 }
  0xef   : > { %v924_v30 = vpop.eup %923 }
  0xf0   : > { %v558_v32 = vadd.f32 1.0, %v924_v30 }
  0xf1   : > { %v926_v31 = vpop.eup %925 }
  0xf2   : > { %v557_v34 = vadd.f32 1.0, %v926_v31  ;;  %v560_v37 = vmul.f32 %v558_v32, %v544_v35 }
  0xf4   : > { %v559_v36 = vmul.f32 %v557_v34, %v543_v33 }
  0xf6   : > { %895 = vmatprep.mubr.msk.f32.mxu1 %vm571_vm1, %v559_v36 }
  0xf7   : > { %896 = vmatmul.mubr.msk.f32.vlgmr.msra.gmra.mxu1 %vm571_vm1, %v560_v37 }
 0x1b7   : > { %v897_v39 = vpop.f32.mrf.mxu1 }
 0x1b8   : > { %v654_v41 = vadd.f32 %v897_v39, %v562_v38 }
 0x1b9   : > { %v644_v42 = vpop.f32.mrf.mxu1 }
 0x1ba   : > { %656 = vst.msk [vmem:[#allocation2 + $0x8] sm:$0xff] %vm445_vm0, %v654_v41  ;;  %v653_v43 = vadd.f32 %v644_v42, %v561_v40 }
 0x1bc   : > { %655 = vst.msk [vmem:[#allocation2] sm:$0xff] %vm445_vm0, %v653_v43 }
 0x1c1   : > { %v663_v46 = vld [vmem:[#allocation2 + $0x8] sm:$0xff] }
 0x1c2   : > { %v665_v48 = vadd.f32 %v663_v46, %v661_v44 }
 0x1c3   : > { %v662_v49 = vld [vmem:[#allocation2] sm:$0xff] }
 0x1c4   : > { %v674_v50 = vadd.f32 %v846_v47, %v665_v48  ;;  %v664_v51 = vadd.f32 %v662_v49, %v660_v45 }
 0x1c6   : > { %676 = vst.msk [vmem:[%s439_s24 + $0x8] sm:$0xff] %vm445_vm0, %v674_v50  ;;  %v673_v52 = vadd.f32 %v846_v47, %v664_v51 }
 0x1c8   : > { %675 = vst.msk [vmem:[%s439_s24] sm:$0xff] %vm445_vm0, %v673_v52 }
 0x1c9 PF: > { %s18_s29 = sadd.s32 1, %s949_s29   ;;  %s1097_s27 = smov %s945_s28 }
 0x1ca   : > { %p15_p5 = scmp.ge.s32.totalorder %s18_s29, 4   ;;  %s1098_s28 = smov %s1100_s6 }
 0x1cc   :  { %17 = sbr.rel (!%p15_p5) target bundleno = 2 (0x2), region = 102 }

// kernel: siglip_forward.15
= control target key start
LH: loop header
LB: loop body
LE: loop exit
PB: predicated region body
PF: predicated region fallthrough
CT: control target
= control target key end

     0   :  { %s955_s24 = smov 0   ;;  %s957_s25 = smov 0   ;;  %s1055_s0 = inlined_call_operand.vmem [shape: f32[2,16,32], index: 0, kind: input, shape index: {}]   ;;  %s1056_s1 = inlined_call_operand.vmem [shape: f32[32,64], index: 1, kind: input, shape index: {}]   ;;  %s1057_s2 = inlined_call_operand.vmem [shape: f32[1,64], index: 2, kind: input, shape index: {}]   ;;  %s1058_s3 = inlined_call_operand.vmem [shape: f32[64,32], index: 3, kind: input, shape index: {}]   ;;  %s1059_s4 = inlined_call_operand.vmem [shape: f32[1,32], index: 4, kind: input, shape index: {}]   ;;  %s1060_s5 = inlined_call_operand.vmem [shape: f32[1,32], index: 5, kind: input, shape index: {}]   ;;  %s1061_s6 = inlined_call_operand.vmem [shape: f32[1,32], index: 6, kind: input, shape index: {}]   ;;  %s1062_s7 = inlined_call_operand.vmem [shape: f32[2,16,32], index: 7, kind: output, shape index: {}]  }
   0x1   :  { %s959_s26 = smov 0  }
   0x2 LB: > { %s36_s27 = sadd.s32 1, %s908_s25  ;;  %p794_p0 = scmp.ge.s32.totalorder %s912_s26, 1  ;;  %s912_s26 = sphi %s959_s26, %s17_s26   ;;  %s908_s25 = sphi %s957_s25, %s1064_s25   ;;  %s904_s24 = sphi %s955_s24, %s1063_s24  }
   0x3   : > { %p38_p1 = scmp.ge.s32.totalorder %s36_s27, 2  ;;  %p293_p2 = scmp.lt.s32.totalorder %s912_s26, 3 }
   0x5   : > { %s1066_s27 = smov (%p38_p1, %s36_s27), 0  ;;  %p294_p3 = pnand %p794_p0, %p293_p2 }
   0x6   : > { %p346_p4 = scmp.lt.s32.totalorder (!%p294_p3), %s904_s24, 1 }
   0x7   : > { %297 = sbr.rel (%p294_p3) target bundleno = 767 (0x2ff), region = 48 }
   0xc   : > { %v390_v0 = vld [vmem:[%s1056_s1 + $0x18] sm:$0xff]  ;;  %v389_v1 = vld [vmem:[%s1056_s1 + $0x10] sm:$0xff]  ;;  %v388_v2 = vld [vmem:[%s1056_s1 + $0x8] sm:$0xff]  ;;  %s1068_s24 = smov (!%p346_p4, %s904_s24), 1  ;;  %vm382_vm0 = vcmask 261120   ;;  %v914_v14 = vmov 0.0  }
   0xd   : > { %827 = vmatprep.subr.mxu0 %v390_v0  ;;  %v387_v3 = vld [vmem:[%s1056_s1] sm:$0xff]  ;;  %s809_s13 = sshll.u32 %s1068_s24, 4  ;;  %v507_v6 = vld [vmem:[%s1058_s3 + $0x38] sm:$0xff]  ;;  %v506_v7 = vld [vmem:[%s1058_s3 + $0x30] sm:$0xff]  ;;  %384 = vst.msk [vmem:[#allocation2 + $0x8] sm:$0xff] %vm382_vm0, %v914_v14  ;;  %vm508_vm1 = vcmask 523264  }
   0xe   : > { %828 = vmatpush3.msra.mxu0 %v390_v0  ;;  %s353_s16 = scalar_lea.vmem %s1055_s0, %s809_s13  ;;  %838 = vmatprep.subr.mxu1 %v507_v6  ;;  %v505_v8 = vld [vmem:[%s1058_s3 + $0x28] sm:$0xff]  ;;  %v504_v9 = vld [vmem:[%s1058_s3 + $0x20] sm:$0xff]  ;;  %v503_v10 = vld [vmem:[%s1058_s3 + $0x18] sm:$0xff]  ;;  %383 = vst.msk [vmem:[#allocation2] sm:$0xff] %vm382_vm0, %v914_v14  ;;  %s376_s29 = scalar_lea.vmem %s1062_s7, %s809_s13 }
   0xf   : > { %829 = vmatprep.subr.mxu0 %v389_v1  ;;  %v385_v4 = vld [vmem:[%s353_s16] sm:$0xff]  ;;  %v386_v5 = vld [vmem:[%s353_s16 + $0x8] sm:$0xff]  ;;  %839 = vmatpush3.msra.mxu1 %v507_v6  ;;  %v502_v11 = vld [vmem:[%s1058_s3 + $0x10] sm:$0xff] }
  0x10   : > { %830 = vmatpush3.msra.mxu0 %v389_v1  ;;  %835 = vmatprep.mubr.msk.f32.mxu0 %vm382_vm0, %v385_v4  ;;  %v501_v12 = vld [vmem:[%s1058_s3 + $0x8] sm:$0xff]  ;;  %v500_v13 = vld [vmem:[%s1058_s3] sm:$0xff] }
  0x11   : > { %831 = vmatprep.subr.mxu0 %v388_v2  ;;  %840 = vmatprep.subr.mxu1 %v506_v7  ;;  %v799_v15 = vld [vmem:[%s1057_s2] ss:$0 sm:$0xff] }
  0x12   : > { %832 = vmatpush3.msra.mxu0 %v388_v2  ;;  %841 = vmatpush3.msra.mxu1 %v506_v7  ;;  %v804_v45 = vld [vmem:[%s1059_s4] ss:$0 sm:$0xff] }
  0x13   : > { %833 = vmatprep.subr.mxu0 %v387_v3  ;;  %842 = vmatprep.subr.mxu1 %v505_v8  ;;  %v805_v4 = vld [vmem:[%s1060_s5] ss:$0 sm:$0xff] }
  0x14   : > { %834 = vmatpush3.msra.mxu0 %v387_v3  ;;  %843 = vmatpush3.msra.mxu1 %v505_v8  ;;  %v499_v38 = vld [vmem:[#allocation2 + $0x8] sm:$0xff]  ;;  %v806_v6 = vld [vmem:[%s1061_s6] ss:$0 sm:$0xff] }
  0x15   : > { %836 = vmatmul.mubr.msk.f32.vlgmr.msra.gmra.mxu0 %vm382_vm0, %v386_v5  ;;  %844 = vmatprep.subr.mxu1 %v504_v9  ;;  %v498_v40 = vld [vmem:[#allocation2] sm:$0xff] }
  0x16   : > { %845 = vmatpush3.msra.mxu1 %v504_v9 }
  0x17   : > { %846 = vmatprep.subr.mxu1 %v503_v10 }
  0x18   : > { %847 = vmatpush3.msra.mxu1 %v503_v10 }
  0x19   : > { %848 = vmatprep.subr.mxu1 %v502_v11 }
  0x1a   : > { %849 = vmatpush3.msra.mxu1 %v502_v11 }
  0x1b   : > { %850 = vmatprep.subr.mxu1 %v501_v12 }
  0x1c   : > { %851 = vmatpush3.msra.mxu1 %v501_v12 }
  0x1d   : > { %852 = vmatprep.subr.mxu1 %v500_v13 }
  0x1e   : > { %853 = vmatpush3.msra.mxu1 %v500_v13 }
  0xd5   : > { %v837_v16 = vpop.f32.mrf.mxu0 }
  0xd6   : > { %v477_v17 = vadd.f32 %v837_v16, %v799_v15 }
  0xd7   : > { %v471_v18 = vpop.f32.mrf.mxu0 }
  0xd8   : > { %v483_v19 = vmul.f32 0.044715, %v477_v17  ;;  %v472_v20 = vadd.f32 %v799_v15, %v471_v18  ;;  %v481_v35 = vmul.f32 0.5, %v477_v17 }
  0xda   : > { %v485_v21 = vmul.f32 %v483_v19, %v477_v17  ;;  %v482_v22 = vmul.f32 0.044715, %v472_v20  ;;  %v480_v33 = vmul.f32 0.5, %v472_v20 }
  0xdc   : > { %v487_v23 = vmul.f32 %v485_v21, %v477_v17  ;;  %v484_v24 = vmul.f32 %v482_v22, %v472_v20 }
  0xde   : > { %v489_v25 = vadd.f32 %v487_v23, %v477_v17  ;;  %v486_v26 = vmul.f32 %v484_v24, %v472_v20 }
  0xe0   : > { %v488_v27 = vadd.f32 %v486_v26, %v472_v20  ;;  %v491_v28 = vmul.f32 0.7978846, %v489_v25 }
  0xe2   : > { %v490_v29 = vmul.f32 0.7978846, %v488_v27  ;;  %882 = vtanh.f32 %v491_v28 }
  0xe4   : > { %884 = vtanh.f32 %v490_v29 }
  0xef   : > { %v883_v30 = vpop.eup %882 }
  0xf0   : > { %v495_v32 = vadd.f32 1.0, %v883_v30 }
  0xf1   : > { %v885_v31 = vpop.eup %884 }
  0xf2   : > { %v494_v34 = vadd.f32 1.0, %v885_v31  ;;  %v497_v37 = vmul.f32 %v495_v32, %v481_v35 }
  0xf4   : > { %v496_v36 = vmul.f32 %v494_v34, %v480_v33 }
  0xf6   : > { %854 = vmatprep.mubr.msk.f32.mxu1 %vm508_vm1, %v496_v36 }
  0xf7   : > { %855 = vmatmul.mubr.msk.f32.vlgmr.msra.gmra.mxu1 %vm508_vm1, %v497_v37 }
 0x1b7   : > { %v856_v39 = vpop.f32.mrf.mxu1 }
 0x1b8   : > { %v591_v41 = vadd.f32 %v856_v39, %v499_v38 }
 0x1b9   : > { %v581_v42 = vpop.f32.mrf.mxu1 }
 0x1ba   : > { %593 = vst.msk [vmem:[#allocation2 + $0x8] sm:$0xff] %vm382_vm0, %v591_v41  ;;  %v590_v43 = vadd.f32 %v581_v42, %v498_v40 }
 0x1bc   : > { %592 = vst.msk [vmem:[#allocation2] sm:$0xff] %vm382_vm0, %v590_v43 }
 0x1c1   : > { %v598_v46 = vld [vmem:[#allocation2 + $0x8] sm:$0xff] }
 0x1c2   : > { %v607_v49 = vadd.f32 %v804_v45, %v598_v46 }
 0x1c3   : > { %v597_v44 = vld [vmem:[#allocation2] sm:$0xff] }
 0x1c4   : > { %v606_v47 = vadd.f32 %v804_v45, %v597_v44  ;;  %v613_v50 = vsel %vm382_vm0, %v607_v49, 0.0 }
 0x1c6   : > { %v610_v48 = vsel %vm382_vm0, %v606_v47, 0.0 }
 0x1c7   : > { %611 = vadd.xlane.f32.xlu0 %v610_v48 }
 0x1cb   : > { %614 = vadd.xlane.f32.xlu0 %v613_v50 }
 0x250   : > { %v612_v51 = vpop.xlane.xlu0 %611 }
 0x251   : > { %v617_v52 = vmul.f32 0.03125, %v612_v51 }
 0x253   : > { %v619_v53 = vsub.f32 %v606_v47, %v617_v52 }
 0x254   : > { %v615_v54 = vpop.xlane.xlu0 %614 }
 0x255   : > { %v618_v55 = vmul.f32 0.03125, %v615_v54  ;;  %v621_v56 = vmul.f32 %v619_v53, %v619_v53 }
 0x257   : > { %v620_v57 = vsub.f32 %v607_v49, %v618_v55  ;;  %v623_v58 = vsel %vm382_vm0, %v621_v56, 0.0 }
 0x258   : > { %624 = vadd.xlane.f32.xlu1 %v623_v58 }
 0x259   : > { %v622_v59 = vmul.f32 %v620_v57, %v620_v57 }
 0x25b   : > { %v626_v60 = vsel %vm382_vm0, %v622_v59, 0.0 }
 0x25c   : > { %627 = vadd.xlane.f32.xlu1 %v626_v60 }
 0x2e1   : > { %v625_v61 = vpop.xlane.xlu1 %624 }
 0x2e2   : > { %v629_v62 = vmul.f32 0.03125, %v625_v61 }
 0x2e4   : > { %v631_v63 = vadd.f32 1e-06, %v629_v62 }
 0x2e5   : > { %v628_v0 = vpop.xlane.xlu1 %627 }
 0x2e6   : > { %886 = vrsqrt.f32 %v631_v63  ;;  %v630_v1 = vmul.f32 0.03125, %v628_v0 }
 0x2e8   : > { %v632_v2 = vadd.f32 1e-06, %v630_v1 }
 0x2ea   : > { %888 = vrsqrt.f32 %v632_v2 }
 0x2f3   : > { %v887_v3 = vpop.eup %886 }
 0x2f4   : > { %v635_v5 = vmul.f32 %v887_v3, %v619_v53 }
 0x2f6   : > { %v643_v7 = vmul.f32 %v805_v4, %v635_v5 }
 0x2f7   : > { %v889_v8 = vpop.eup %888 }
 0x2f8   : > { %v651_v9 = vadd.f32 %v806_v6, %v643_v7  ;;  %v636_v10 = vmul.f32 %v889_v8, %v620_v57 }
 0x2fa   : > { %653 = vst.msk [vmem:[%s376_s29] sm:$0xff] %vm382_vm0, %v651_v9  ;;  %v644_v11 = vmul.f32 %v805_v4, %v636_v10 }
 0x2fc   : > { %v652_v12 = vadd.f32 %v806_v6, %v644_v11 }
 0x2fe   : > { %654 = vst.msk [vmem:[%s376_s29 + $0x8] sm:$0xff] %vm382_vm0, %v652_v12 }
 0x2ff PF: > { %s17_s26 = sadd.s32 1, %s912_s26   ;;  %s1063_s24 = smov %s908_s25 }
 0x300   : > { %p14_p5 = scmp.ge.s32.totalorder %s17_s26, 4   ;;  %s1064_s25 = smov %s1066_s27 }
 0x302   :  { %16 = sbr.rel (!%p14_p5) target bundleno = 2 (0x2), region = 95 }

// kernel: siglip_forward.21
= control target key start
LH: loop header
LB: loop body
LE: loop exit
PB: predicated region body
PF: predicated region fallthrough
CT: control target
= control target key end

     0   :  { %13 = vsyncpa [#allocation4], 0  ;;  %s1322_s0 = inlined_call_operand.vmem [shape: f32[2,16,32], index: 0, kind: input, shape index: {}]   ;;  %s1323_s1 = inlined_call_operand.vmem [shape: f32[2,16,32], index: 1, kind: input, shape index: {}]   ;;  %s1324_s2 = inlined_call_operand.vmem [shape: f32[32,64], index: 2, kind: input, shape index: {}]   ;;  %s1325_s3 = inlined_call_operand.vmem [shape: f32[1,64], index: 3, kind: input, shape index: {}]   ;;  %s1326_s4 = inlined_call_operand.vmem [shape: f32[64,32], index: 4, kind: input, shape index: {}]   ;;  %s1327_s5 = inlined_call_operand.vmem [shape: f32[1,32], index: 5, kind: input, shape index: {}]   ;;  %s1328_s6 = inlined_call_operand.vmem [shape: f32[1,32], index: 6, kind: input, shape index: {}]   ;;  %s1329_s7 = inlined_call_operand.vmem [shape: f32[1,32], index: 7, kind: input, shape index: {}]   ;;  %s1330_s8 = inlined_call_operand.hbm [shape: f32[2,16,32], index: 8, kind: output, shape index: {}]  }
   0x1   :  { %15 = vsyncpa [#allocation4 + $0x1], 0  ;;  %s1138_s27 = smov 0   ;;  %s1140_s28 = smov 0  }
   0x2   :  { %s1142_s29 = smov 0   ;;  %s1144_s30 = smov 0  }
   0x3   :  { %s1146_s9 = smov 0   ;;  %s1148_s10 = smov 0  }
   0x4 LB: > { %s870_s11 = sadd.s32 4294967295, %s1087_s10   ;;  %s871_s12 = sadd.s32 4294967294, %s1087_s10   ;;  %s1087_s10 = sphi %s1148_s10, %s21_s10   ;;  %s1083_s9 = sphi %s1146_s9, %s1337_s9   ;;  %s1079_s30 = sphi %s1144_s30, %s1336_s30   ;;  %s1075_s29 = sphi %s1142_s29, %s1335_s29   ;;  %s1071_s28 = sphi %s1140_s28, %s1334_s28   ;;  %s1067_s27 = sphi %s1138_s27, %s1333_s27  }
   0x5   : > { %s40_s13 = sadd.s32 1, %s1083_s9  ;;  %s246_s14 = sadd.s32 1, %s1075_s29 }
   0x6   : > { %p42_p0 = scmp.ge.s32.totalorder %s40_s13, 2  ;;  %p256_p1 = scmp.ne.s32.totalorder %s1075_s29, %s1071_s28 }
   0x7   : > { %p257_p2 = scmp.eq.s32.totalorder %s870_s11, 1  ;;  %p262_p3 = scmp.ne.s32.totalorder %s1071_s28, %s1067_s27 }
   0x8   : > { %s1339_s13 = smov (%p42_p0, %s40_s13), 0  ;;  %p263_p5 = scmp.eq.s32.totalorder %s871_s12, 1 }
   0x9   : > { %p1178_p4 = por %p257_p2, %p256_p1  ;;  %s241_s16 = ssub.s32 %s1083_s9, %s1339_s13 }
   0xa   : > { %p877_p6 = scmp.ge.s32.totalorder %s1087_s10, 1  ;;  %p244_p7 = scmp.eq.s32.totalorder %s241_s16, 0 }
   0xb   : > { %p1185_p8 = por %p263_p5, %p262_p3  ;;  %p338_p9 = scmp.lt.s32.totalorder %s1087_s10, 3 }
   0xc   : > { %s1191_s18 = scalar_select %p244_p7, %s1075_s29, %s246_s14  }
   0xd   : > { %p339_p10 = pnand %p877_p6, %p338_p9 }
   0xe   : > { %p398_p11 = scmp.lt.s32.totalorder (!%p339_p10), %s1079_s30, 1  ;;  %s898_s14 = sshll.u32 (!%p339_p10), %s1079_s30, 8 }
   0xf   : > { %342 = sbr.rel (%p339_p10) target bundleno = 790 (0x316), region = 52  ;;  %s1272_s22 = scalar_lea.hbm (!%p339_p10), %s1330_s8, %s898_s14 }
  0x10   : > { %s1090_s23 = smov (!%p339_p10), [#allocation3]  }
  0x14   : > { %v443_v0 = vld [vmem:[%s1324_s2 + $0x18] sm:$0xff]  ;;  %v442_v1 = vld [vmem:[%s1324_s2 + $0x10] sm:$0xff]  ;;  %v441_v2 = vld [vmem:[%s1324_s2 + $0x8] sm:$0xff]  ;;  %s1204_s25 = scalar_select %p398_p11, %s1079_s30, 1  ;;  %vm435_vm0 = vcmask 261120   ;;  %v1089_v14 = vmov 0.0  }
  0x15   : > { %915 = vmatprep.subr.mxu0 %v443_v0  ;;  %v440_v3 = vld [vmem:[%s1324_s2] sm:$0xff]  ;;  %v560_v6 = vld [vmem:[%s1326_s4 + $0x38] sm:$0xff]  ;;  %v559_v7 = vld [vmem:[%s1326_s4 + $0x30] sm:$0xff]  ;;  %437 = vst.msk [vmem:[#allocation2 + $0x8] sm:$0xff] %vm435_vm0, %v1089_v14  ;;  %vm561_vm1 = vcmask 523264  }
  0x16   : > { %916 = vmatpush3.msra.mxu0 %v443_v0  ;;  %s896_s12 = sshll.u32 %s1204_s25, 4  ;;  %926 = vmatprep.subr.mxu1 %v560_v6  ;;  %v558_v8 = vld [vmem:[%s1326_s4 + $0x28] sm:$0xff]  ;;  %v557_v9 = vld [vmem:[%s1326_s4 + $0x20] sm:$0xff]  ;;  %v556_v10 = vld [vmem:[%s1326_s4 + $0x18] sm:$0xff]  ;;  %436 = vst.msk [vmem:[#allocation2] sm:$0xff] %vm435_vm0, %v1089_v14  ;;  %s394_s25 = sand.u32 1, %s1071_s28  }
  0x17   : > { %917 = vmatprep.subr.mxu0 %v442_v1  ;;  %s405_s19 = scalar_lea.vmem %s1322_s0, %s896_s12  ;;  %927 = vmatpush3.msra.mxu1 %v560_v6  ;;  %v555_v11 = vld [vmem:[%s1326_s4 + $0x10] sm:$0xff]  ;;  %v554_v12 = vld [vmem:[%s1326_s4 + $0x8] sm:$0xff]  ;;  %v553_v13 = vld [vmem:[%s1326_s4] sm:$0xff]  ;;  %s415_s20 = scalar_lea.vmem %s1323_s1, %s896_s12 }
  0x18   : > { %918 = vmatpush3.msra.mxu0 %v442_v1  ;;  %v438_v4 = vld [vmem:[%s405_s19] sm:$0xff]  ;;  %v439_v5 = vld [vmem:[%s405_s19 + $0x8] sm:$0xff]  ;;  %928 = vmatprep.subr.mxu1 %v559_v7  ;;  %s878_s24 = sshll.u32 %s394_s25, 4  ;;  %s1277_s12 = scalar_lea.sflag [#allocation4], %s394_s25 }
  0x19   : > { %919 = vmatprep.subr.mxu0 %v441_v2  ;;  %923 = vmatprep.mubr.msk.f32.mxu0 %vm435_vm0, %v438_v4  ;;  %v883_v15 = vld [vmem:[%s1325_s3] ss:$0 sm:$0xff]  ;;  %v651_v45 = vld [vmem:[%s415_s20 + $0x8] sm:$0xff]  ;;  %s396_s16 = scalar_lea.vmem [#allocation3], %s878_s24  ;;  %s1015_s24 = sshll.u32 %s1090_s23, 4  ;;  %s1016_s24 = int_to_ptr.vmem [resolvable:$false] %s1015_s24 }
  0x1a   : > { %920 = vmatpush3.msra.mxu0 %v441_v2  ;;  %929 = vmatpush3.msra.mxu1 %v559_v7  ;;  %v650_v44 = vld [vmem:[%s415_s20] sm:$0xff]  ;;  %s728_s19 = sshll.u32 %s396_s16, 4  ;;  %s1017_s26 = scalar_lea.vmem %s1016_s24, 512  ;;  %s1274_s19 = int_to_ptr.vmem [resolvable:$true] %s728_s19 }
  0x1b   : > { %921 = vmatprep.subr.mxu0 %v440_v3  ;;  %930 = vmatprep.subr.mxu1 %v558_v8  ;;  %v888_v50 = vld [vmem:[%s1327_s5] ss:$0 sm:$0xff]  ;;  %s1011_s30 = scalar_lea.vmem %s1274_s19, 256  ;;  %p1018_p1 = scmp.lt.s32.totalorder %s1274_s19, %s1016_s24 }
  0x1c   : > { %922 = vmatpush3.msra.mxu0 %v440_v3  ;;  %931 = vmatpush3.msra.mxu1 %v558_v8  ;;  %v552_v38 = vld [vmem:[#allocation2 + $0x8] sm:$0xff]  ;;  %v889_v8 = vld [vmem:[%s1328_s6] ss:$0 sm:$0xff]  ;;  %p1012_p12 = scmp.ne.s32.totalorder %s1274_s19, %s1011_s30  ;;  %p1019_p2 = scmp.lt.s32.totalorder %s1017_s26, %s1011_s30 }
  0x1d   : > { %924 = vmatmul.mubr.msk.f32.vlgmr.msra.gmra.mxu0 %vm435_vm0, %v439_v5  ;;  %932 = vmatprep.subr.mxu1 %v557_v9  ;;  %v551_v40 = vld [vmem:[#allocation2] sm:$0xff] }
  0x1e   : > { %933 = vmatpush3.msra.mxu1 %v557_v9  ;;  %p1013_p13 = pnand %p1012_p12, %p1178_p4  ;;  %p1020_p3 = por %p1019_p2, %p1018_p1 }
  0x1f   : > { %934 = vmatprep.subr.mxu1 %v556_v10 }
  0x20   : > { %935 = vmatpush3.msra.mxu1 %v556_v10  ;;  %v890_v10 = vld [vmem:[%s1329_s7] ss:$0 sm:$0xff]  ;;  %p1014_p0 = pneg %p1013_p13 }
  0x21   : > { %936 = vmatprep.subr.mxu1 %v555_v11 }
  0x22   : > { %937 = vmatpush3.msra.mxu1 %v555_v11  ;;  %p1021_p5 = pnand %p1020_p3, %p1014_p0 }
  0x23   : > { %938 = vmatprep.subr.mxu1 %v554_v12 }
  0x24   : > { %939 = vmatpush3.msra.mxu1 %v554_v12 }
  0x25   : > { %940 = vmatprep.subr.mxu1 %v553_v13 }
  0x26   : > { %941 = vmatpush3.msra.mxu1 %v553_v13 }
  0xdd   : > { %v925_v16 = vpop.f32.mrf.mxu0 }
  0xde   : > { %v530_v17 = vadd.f32 %v925_v16, %v883_v15 }
  0xdf   : > { %v524_v18 = vpop.f32.mrf.mxu0 }
  0xe0   : > { %v536_v19 = vmul.f32 0.044715, %v530_v17  ;;  %v525_v20 = vadd.f32 %v883_v15, %v524_v18  ;;  %v534_v35 = vmul.f32 0.5, %v530_v17 }
  0xe2   : > { %v538_v21 = vmul.f32 %v536_v19, %v530_v17  ;;  %v535_v22 = vmul.f32 0.044715, %v525_v20  ;;  %v533_v33 = vmul.f32 0.5, %v525_v20 }
  0xe4   : > { %v540_v23 = vmul.f32 %v538_v21, %v530_v17  ;;  %v537_v24 = vmul.f32 %v535_v22, %v525_v20 }
  0xe6   : > { %v542_v25 = vadd.f32 %v540_v23, %v530_v17  ;;  %v539_v26 = vmul.f32 %v537_v24, %v525_v20 }
  0xe8   : > { %v541_v27 = vadd.f32 %v539_v26, %v525_v20  ;;  %v544_v28 = vmul.f32 0.7978846, %v542_v25 }
  0xea   : > { %v543_v29 = vmul.f32 0.7978846, %v541_v27  ;;  %1003 = vtanh.f32 %v544_v28 }
  0xec   : > { %1005 = vtanh.f32 %v543_v29 }
  0xf7   : > { %v1004_v30 = vpop.eup %1003 }
  0xf8   : > { %v548_v32 = vadd.f32 1.0, %v1004_v30 }
  0xf9   : > { %v1006_v31 = vpop.eup %1005 }
  0xfa   : > { %v547_v34 = vadd.f32 1.0, %v1006_v31  ;;  %v550_v37 = vmul.f32 %v548_v32, %v534_v35 }
  0xfc   : > { %v549_v36 = vmul.f32 %v547_v34, %v533_v33 }
  0xfe   : > { %942 = vmatprep.mubr.msk.f32.mxu1 %vm561_vm1, %v549_v36 }
  0xff   : > { %943 = vmatmul.mubr.msk.f32.vlgmr.msra.gmra.mxu1 %vm561_vm1, %v550_v37 }
 0x1bf   : > { %v944_v39 = vpop.f32.mrf.mxu1 }
 0x1c0   : > { %v644_v41 = vadd.f32 %v944_v39, %v552_v38 }
 0x1c1   : > { %v634_v42 = vpop.f32.mrf.mxu1 }
 0x1c2   : > { %646 = vst.msk [vmem:[#allocation2 + $0x8] sm:$0xff] %vm435_vm0, %v644_v41  ;;  %v643_v43 = vadd.f32 %v634_v42, %v551_v40 }
 0x1c4   : > { %645 = vst.msk [vmem:[#allocation2] sm:$0xff] %vm435_vm0, %v643_v43 }
 0x1c9   : > { %v653_v46 = vld [vmem:[#allocation2 + $0x8] sm:$0xff] }
 0x1ca   : > { %v655_v49 = vadd.f32 %v653_v46, %v651_v45 }
 0x1cb   : > { %v652_v47 = vld [vmem:[#allocation2] sm:$0xff] }
 0x1cc   : > { %v654_v48 = vadd.f32 %v652_v47, %v650_v44  ;;  %v664_v53 = vadd.f32 %v888_v50, %v655_v49 }
 0x1ce   : > { %v663_v51 = vadd.f32 %v888_v50, %v654_v48  ;;  %v670_v54 = vsel %vm435_vm0, %v664_v53, 0.0 }
 0x1d0   : > { %v667_v52 = vsel %vm435_vm0, %v663_v51, 0.0 }
 0x1d1   : > { %668 = vadd.xlane.f32.xlu0 %v667_v52 }
 0x1d5   : > { %671 = vadd.xlane.f32.xlu0 %v670_v54 }
 0x25a   : > { %v669_v55 = vpop.xlane.xlu0 %668 }
 0x25b   : > { %v674_v56 = vmul.f32 0.03125, %v669_v55 }
 0x25d   : > { %v676_v57 = vsub.f32 %v663_v51, %v674_v56 }
 0x25e   : > { %v672_v58 = vpop.xlane.xlu0 %671 }
 0x25f   : > { %v675_v59 = vmul.f32 0.03125, %v672_v58  ;;  %v678_v60 = vmul.f32 %v676_v57, %v676_v57 }
 0x261   : > { %v677_v61 = vsub.f32 %v664_v53, %v675_v59  ;;  %v680_v62 = vsel %vm435_vm0, %v678_v60, 0.0 }
 0x262   : > { %681 = vadd.xlane.f32.xlu1 %v680_v62 }
 0x263   : > { %v679_v63 = vmul.f32 %v677_v61, %v677_v61 }
 0x265   : > { %v683_v0 = vsel %vm435_vm0, %v679_v63, 0.0 }
 0x266   : > { %684 = vadd.xlane.f32.xlu1 %v683_v0 }
 0x2eb   : > { %v682_v1 = vpop.xlane.xlu1 %681 }
 0x2ec   : > { %v686_v2 = vmul.f32 0.03125, %v682_v1 }
 0x2ee   : > { %v688_v3 = vadd.f32 1e-06, %v686_v2 }
 0x2ef   : > { %v685_v4 = vpop.xlane.xlu1 %684 }
 0x2f0   : > { %1007 = vrsqrt.f32 %v688_v3  ;;  %v687_v5 = vmul.f32 0.03125, %v685_v4 }
 0x2f2   : > { %v689_v6 = vadd.f32 1e-06, %v687_v5 }
 0x2f4   : > { %1009 = vrsqrt.f32 %v689_v6 }
 0x2fd   : > { %v1008_v7 = vpop.eup %1007 }
 0x2fe   : > { %v692_v9 = vmul.f32 %v1008_v7, %v676_v57 }
 0x300   : > { %v700_v11 = vmul.f32 %v889_v8, %v692_v9 }
 0x301   : > { %v1010_v12 = vpop.eup %1009 }
 0x302   : > { %v693_v13 = vmul.f32 %v1010_v12, %v677_v61  ;;  %v708_v14 = vadd.f32 %v890_v10, %v700_v11 }
 0x304   : > { %v701_v15 = vmul.f32 %v889_v8, %v693_v13  ;;  %710 = vst.msk [vmem:[%s396_s16] sm:$0xff] %vm435_vm0, %v708_v14 }
 0x306   : > { %v709_v16 = vadd.f32 %v890_v10, %v701_v15 }
 0x308   : > { %711 = vst.msk [vmem:[%s396_s16 + $0x8] sm:$0xff] %vm435_vm0, %v709_v16 }
 0x309   : > { %1024 = shalt.err (!%p1021_p5)
}
 0x30a   : > { %s1025_s25 = scalar_lea.hbm %s1272_s22, 256  ;;  %s1029_s16 = scalar_lea.hbm %s1330_s8, 512 }
 0x30b   : > { %p1026_p6 = scmp.ne.s32.totalorder %s1272_s22, %s1025_s25  ;;  %p1030_p10 = scmp.lt.s32.totalorder %s1272_s22, %s1330_s8 }
 0x30c   : > { %p1031_p11 = scmp.lt.s32.totalorder %s1029_s16, %s1025_s25 }
 0x30d   : > { %p1027_p7 = pnand %p1026_p6, %p1178_p4 }
 0x30e   : > { %p1032_p12 = por %p1031_p11, %p1030_p10 }
 0x30f   : > { %p1028_p9 = pneg %p1027_p7 }
 0x311   : > { %p1033_p13 = pnand %p1032_p12, %p1028_p9 }
 0x313   : > { %1036 = shalt.err (!%p1033_p13)
}
 0x314   : > { %s1091_s30 = smov 128   ;;  %s1092_s23 = smov 8  }
 0x315   : > { %945 = dma.vmem_to_hbm [thread:$0]  (%p1178_p4), %s1274_s19, 256, %s1272_s22, %s1277_s12, %s1091_s30, %s1091_s30, %s1092_s23  }
 0x316 PF: > { %p951_p0 = scmp.ge.s32.totalorder %s1087_s10, 2  ;;  %s743_s24 = sand.u32 1, %s1067_s27  }
 0x317   : > { %s744_s26 = scalar_lea.sflag [#allocation4], %s743_s24 }
 0x318   : > { %p948_p1 = pnand %p951_p0, %p1185_p8 }
 0x31a   : > { %p949_p2 = pneg %p948_p1 }
 0x31c   : > { %1062 = dma.done.wait (%p949_p2), %s744_s26, 256  }
 0x31d   : > { %1064 = vsyncadd (%p949_p2), %s744_s26, 4294967040  ;;  %s21_s10 = sadd.s32 1, %s1087_s10   ;;  %s1333_s27 = smov %s1071_s28 }
 0x31e   : > { %p18_p3 = scmp.ge.s32.totalorder %s21_s10, 4   ;;  %s1334_s28 = smov %s1075_s29 }
 0x31f   : > { %s1335_s29 = smov %s1191_s18  ;;  %s1336_s30 = smov %s1083_s9 }
 0x320   : > { %s1337_s9 = smov %s1339_s13  ;;  %20 = sbr.rel (!%p18_p3) target bundleno = 4 (0x4), region = 107 }
 0x325   :  { %749 = vsyncpa [#allocation4], 1 }
 0x326   :  { %751 = vsyncpa [#allocation4 + $0x1], 1 }

</bundles_post_ra>
